<compile_context>
chip_gen: v5e
topology: v5e:2x2
jax: 0.10.0
libtpu: 0.0.40
codegen_flags: <defaults>
</compile_context>

<pallas_src>
import jax
import jax.numpy as jnp
from jax.experimental import pallas as pl
from jax.experimental.pallas import tpu as pltpu

BN_EPS = 1e-5


def _round_up(n, m):
    return ((n + m - 1) // m) * m


def _pad_axis(a, axis, target):
    pad = target - a.shape[axis]
    if pad <= 0:
        return a
    widths = [(0, 0)] * a.ndim
    widths[axis] = (0, pad)
    return jnp.pad(a, widths)


# --------------------- resident-weights kernel (default path) ----------------
def _mlp_resident_kernel(x_ref, w1_ref, b1_ref, w2_ref, b2_ref, o_ref):
    # grid = (Bp // tb,)
    #   x_ref : (tb, Fp)  bf16   streamed per batch tile
    #   w1_ref: (Fp, Fp)  bf16   VMEM-resident (BN pre-folded)
    #   b1_ref: (1, Fp)   f32    VMEM-resident (BN pre-folded)
    #   w2_ref: (Fp, Cp)  bf16   VMEM-resident
    #   b2_ref: (1, Cp)   f32    VMEM-resident
    #   o_ref : (tb, Cp)  f32
    h = jnp.dot(x_ref[...], w1_ref[...], preferred_element_type=jnp.float32)
    h = jnp.maximum(h + b1_ref[...], 0.0)
    o_ref[...] = (
        jnp.dot(h.astype(w2_ref.dtype), w2_ref[...],
                preferred_element_type=jnp.float32)
        + b2_ref[...]
    )


# --------------------- streamed-weights kernel (large-F fallback) ------------
def _mlp_streamed_kernel(x_ref, w1_ref, b1_ref, w2_ref, b2_ref, o_ref):
    # grid = (Bp // tb, Fp // tn); j is the reduction axis (last, "arbitrary").
    j = pl.program_id(1)

    @pl.when(j == 0)
    def _init():
        # Fold b2 into the accumulator init (no separate finalize pass).
        o_ref[...] = jnp.broadcast_to(b2_ref[...], o_ref.shape).astype(o_ref.dtype)

    h = jnp.dot(x_ref[...], w1_ref[...], preferred_element_type=jnp.float32)
    h = jnp.maximum(h + b1_ref[...], 0.0)
    o_ref[...] += jnp.dot(h.astype(w2_ref.dtype), w2_ref[...],
                          preferred_element_type=jnp.float32)


def mlp_forward(x, params):
    """Eval-mode MLP forward. x: (B, ...) -> flattened to (B, num_features)."""
    B = x.shape[0]
    x2 = x.reshape(B, -1).astype(jnp.float32)
    F = x2.shape[1]
    C = params["w2"].shape[1]

    # --- Fold eval-mode BatchNorm1d into Linear 1 (f32, before bf16 cast). ---
    scale = params["gamma"].astype(jnp.float32) * jax.lax.rsqrt(
        params["var"].astype(jnp.float32) + BN_EPS)                       # (1, F)
    w1f = params["w1"].astype(jnp.float32) * scale                        # (F, F)
    b1f = (params["b1"].astype(jnp.float32) - params["mean"]) * scale + params["beta"]
    w2f = params["w2"].astype(jnp.float32)                                # (F, C)
    b2f = params["b2"].astype(jnp.float32)                                # (1, C)

    # --- Lane/sublane-friendly padding: F, C -> x128; B -> x8, capped tile. ---
    Fp = max(_round_up(F, 128), 128)
    Cp = max(_round_up(C, 128), 128)
    w1f = _pad_axis(_pad_axis(w1f, 0, Fp), 1, Fp)
    b1f = _pad_axis(b1f, 1, Fp)
    w2f = _pad_axis(_pad_axis(w2f, 0, Fp), 1, Cp)
    b2f = _pad_axis(b2f, 1, Cp)
    x2 = _pad_axis(x2, 1, Fp)

    tb = min(256, _round_up(B, 8))          # sublane-aligned, fills MXU M dim
    Bp = _round_up(B, tb)
    x2 = _pad_axis(x2, 0, Bp)

    xb = x2.astype(jnp.bfloat16)
    w1b = w1f.astype(jnp.bfloat16)
    w2b = w2f.astype(jnp.bfloat16)
    # TODO(synk): int8 (v5e/v6e) / fp8 (v7x) weight storage would further halve
    #             the memory-bound weight traffic; needs accuracy validation.

    # --- Generation-aware VMEM budget. ---
    try:
        vmem_cap = int(pltpu.get_tpu_info().vmem_capacity_bytes)
    except Exception:
        vmem_cap = 64 * 1024 * 1024          # conservative (v7x per-TC)
    vmem_limit = int(min(vmem_cap * 3 // 4, 96 * 1024 * 1024))
    tile_budget = vmem_limit // 2            # headroom for compiler scratch

    def _resident_cost(tb_):
        # Conservative: count every pipelined buffer as double-buffered.
        return (2 * (Fp * Fp + Fp * Cp) * 2          # W1, W2 (bf16)
                + 2 * (Fp + Cp) * 4                  # biases (f32)
                + 2 * tb_ * Fp * 2                   # x tile (bf16)
                + 2 * tb_ * Cp * 4                   # out tile (f32)
                + tb_ * Fp * 4)                      # f32 intermediate h

    if _resident_cost(tb) <= tile_budget:
        # ---------------- resident-weights path (default shapes) -------------
        out = pl.pallas_call(
            _mlp_resident_kernel,
            out_shape=jax.ShapeDtypeStruct((Bp, Cp), jnp.float32),
            grid=(Bp // tb,),
            in_specs=[
                pl.BlockSpec((tb, Fp), lambda i: (i, 0)),   # x row-tile
                pl.BlockSpec((Fp, Fp), lambda i: (0, 0)),   # W1' (resident)
                pl.BlockSpec((1, Fp), lambda i: (0, 0)),    # b1' (resident)
                pl.BlockSpec((Fp, Cp), lambda i: (0, 0)),   # W2 (resident)
                pl.BlockSpec((1, Cp), lambda i: (0, 0)),    # b2 (resident)
            ],
            out_specs=pl.BlockSpec((tb, Cp), lambda i: (i, 0)),
            compiler_params=pltpu.CompilerParams(
                dimension_semantics=("parallel",),
                vmem_limit_bytes=vmem_limit,
            ),
        )(xb, w1b, b1f, w2b, b2f)
    else:
        # ---------------- streamed-weights fallback (large F) ----------------
        def _streamed_cost(tn_):
            return (2 * (Fp * tn_ + tn_ * Cp) * 2    # W1 col-tile, W2 row-tile
                    + 2 * (tn_ + Cp) * 4             # bias tiles
                    + 2 * tb * Fp * 2                # x row-tile (resident)
                    + 2 * tb * Cp * 4                # out accumulator
                    + tb * tn_ * 4)                  # f32 intermediate h

        candidates = sorted(
            {c for c in (Fp, 4096, 2048, 1024, 512, 256, 128)
             if c <= Fp and Fp % c == 0},
            reverse=True)
        tn = 128
        for c in candidates:
            if _streamed_cost(c) <= tile_budget:
                tn = c
                break

        out = pl.pallas_call(
            _mlp_streamed_kernel,
            out_shape=jax.ShapeDtypeStruct((Bp, Cp), jnp.float32),
            grid=(Bp // tb, Fp // tn),
            in_specs=[
                pl.BlockSpec((tb, Fp), lambda i, j: (i, 0)),   # x (resident over j)
                pl.BlockSpec((Fp, tn), lambda i, j: (0, j)),   # W1' column tile
                pl.BlockSpec((1, tn), lambda i, j: (0, j)),    # b1' tile
                pl.BlockSpec((tn, Cp), lambda i, j: (j, 0)),   # W2 row tile
                pl.BlockSpec((1, Cp), lambda i, j: (0, 0)),    # b2
            ],
            out_specs=pl.BlockSpec((tb, Cp), lambda i, j: (i, 0)),
            compiler_params=pltpu.CompilerParams(
                dimension_semantics=("parallel", "arbitrary"),
                vmem_limit_bytes=vmem_limit,
            ),
        )(xb, w1b, b1f, w2b, b2f)

    return out[:B, :C]


def init_params(key, num_features, num_classes):
    k1, k2, k3, k4 = jax.random.split(key, 4)
    s1 = 1.0 / jnp.sqrt(num_features)
    return {
        # nn.Linear(num_features, num_features): weight stored transposed (in, out)
        "w1": jax.random.uniform(k1, (num_features, num_features), jnp.float32, -s1, s1),
        "b1": jax.random.uniform(k2, (1, num_features), jnp.float32, -s1, s1),
        # nn.BatchNorm1d defaults: gamma=1, beta=0, running_mean=0, running_var=1
        "gamma": jnp.ones((1, num_features), jnp.float32),
        "beta": jnp.zeros((1, num_features), jnp.float32),
        "mean": jnp.zeros((1, num_features), jnp.float32),
        "var": jnp.ones((1, num_features), jnp.float32),
        # nn.Linear(num_features, num_classes): stored transposed (in, out)
        "w2": jax.random.uniform(k3, (num_features, num_classes), jnp.float32, -s1, s1),
        "b2": jax.random.uniform(k4, (1, num_classes), jnp.float32, -s1, s1),
    }


if __name__ == "__main__":
    # Module defaults: num_features = num_classes = 512; small batch of 4.
    # Input (4, 8, 64) exercises the x.view(B, -1) flatten -> (4, 512).
    B, num_features, num_classes = 4, 512, 512
    key = jax.random.PRNGKey(0)
    kx, kp = jax.random.split(key)

    x = jax.random.normal(kx, (B, 8, 64), jnp.float32)
    params = init_params(kp, num_features, num_classes)

    out = mlp_forward(x, params)
    jax.block_until_ready(out)
    assert out.shape == (B, num_classes)

    # Reference 1: same mixed-precision math path (bf16 weights, f32 accumulate).
    scale = params["gamma"] * jax.lax.rsqrt(params["var"] + BN_EPS)
    w1f = (params["w1"] * scale).astype(jnp.bfloat16)
    b1f = (params["b1"] - params["mean"]) * scale + params["beta"]
    w2b = params["w2"].astype(jnp.bfloat16)
    xb = x.reshape(B, -1).astype(jnp.bfloat16)
    h = jnp.maximum(jnp.dot(xb, w1f, preferred_element_type=jnp.float32) + b1f, 0.0)
    ref = jnp.dot(h.astype(jnp.bfloat16), w2b,
                  preferred_element_type=jnp.float32) + params["b2"]
    assert jnp.allclose(out, ref, atol=2e-2, rtol=2e-2), (
        float(jnp.max(jnp.abs(out - ref))))

    # Reference 2: pure-f32 eval-mode module forward (semantic sanity check).
    xf = x.reshape(B, -1)
    y = xf @ params["w1"] + params["b1"]
    h32 = jnp.maximum((y - params["mean"]) * scale + params["beta"], 0.0)
    ref32 = h32 @ params["w2"] + params["b2"]
    assert jnp.allclose(out, ref32, atol=1e-1, rtol=1e-1), (
        float(jnp.max(jnp.abs(out - ref32))))

    print("KERNEL_OK")
</pallas_src>

<mosaic_0001>
module attributes {stable_mosaic.version = 11 : i64} {
  func.func @_mlp_resident_kernel(%arg0: i32, %arg1: memref<8x512xbf16, #tpu.memory_space<vmem>>, %arg2: memref<512x512xbf16, #tpu.memory_space<vmem>>, %arg3: memref<1x512xf32, #tpu.memory_space<vmem>>, %arg4: memref<512x512xbf16, #tpu.memory_space<vmem>>, %arg5: memref<1x512xf32, #tpu.memory_space<vmem>>, %arg6: memref<8x512xf32, #tpu.memory_space<vmem>>) attributes {dimension_semantics = [#tpu.dimension_semantics<parallel>], iteration_bounds = array<i64: 1>, scalar_prefetch = 0 : i64, scratch_operands = 0 : i64, tpu.core_type = #tpu.core_type<tc>, window_params = [{transform_indices = @transform_0, window_bounds = array<i64: 8, 512>}, {pipeline_mode = #tpu.pipeline_mode<synchronous>, transform_indices = @transform_1, window_bounds = array<i64: 512, 512>}, {pipeline_mode = #tpu.pipeline_mode<synchronous>, transform_indices = @transform_2, window_bounds = array<i64: 1, 512>}, {pipeline_mode = #tpu.pipeline_mode<synchronous>, transform_indices = @transform_3, window_bounds = array<i64: 512, 512>}, {pipeline_mode = #tpu.pipeline_mode<synchronous>, transform_indices = @transform_4, window_bounds = array<i64: 1, 512>}, {transform_indices = @transform_5, window_bounds = array<i64: 8, 512>}]} {
    %c0 = arith.constant 0 : index
    %c0_0 = arith.constant 0 : index
    %0 = vector.load %arg1[%c0, %c0_0] : memref<8x512xbf16, #tpu.memory_space<vmem>>, vector<8x512xbf16>
    %c0_1 = arith.constant 0 : index
    %c0_2 = arith.constant 0 : index
    %1 = vector.load %arg2[%c0_1, %c0_2] : memref<512x512xbf16, #tpu.memory_space<vmem>>, vector<512x512xbf16>
    %cst = arith.constant dense<0.000000e+00> : vector<8x512xf32>
    %2 = tpu.matmul %0, %1, %cst {dimension_numbers = #tpu.dot_dimension_numbers<[1], [0], [0], [1], [0, 0, 1, 1], [], []>} : vector<8x512xbf16>, vector<512x512xbf16>, vector<8x512xf32> -> vector<8x512xf32>
    %c0_3 = arith.constant 0 : index
    %c0_4 = arith.constant 0 : index
    %3 = vector.load %arg3[%c0_3, %c0_4] : memref<1x512xf32, #tpu.memory_space<vmem>>, vector<1x512xf32>
    %4 = vector.broadcast %3 : vector<1x512xf32> to vector<8x512xf32>
    %5 = arith.addf %2, %4 : vector<8x512xf32>
    %cst_5 = arith.constant 0.000000e+00 : f32
    %6 = vector.broadcast %cst_5 : f32 to vector<8x512xf32>
    %7 = arith.maximumf %5, %6 : vector<8x512xf32>
    %8 = arith.truncf %7 : vector<8x512xf32> to vector<8x512xbf16>
    %c0_6 = arith.constant 0 : index
    %c0_7 = arith.constant 0 : index
    %9 = vector.load %arg4[%c0_6, %c0_7] : memref<512x512xbf16, #tpu.memory_space<vmem>>, vector<512x512xbf16>
    %cst_8 = arith.constant dense<0.000000e+00> : vector<8x512xf32>
    %10 = tpu.matmul %8, %9, %cst_8 {dimension_numbers = #tpu.dot_dimension_numbers<[1], [0], [0], [1], [0, 0, 1, 1], [], []>} : vector<8x512xbf16>, vector<512x512xbf16>, vector<8x512xf32> -> vector<8x512xf32>
    %c0_9 = arith.constant 0 : index
    %c0_10 = arith.constant 0 : index
    %11 = vector.load %arg5[%c0_9, %c0_10] : memref<1x512xf32, #tpu.memory_space<vmem>>, vector<1x512xf32>
    %12 = vector.broadcast %11 : vector<1x512xf32> to vector<8x512xf32>
    %13 = arith.addf %10, %12 : vector<8x512xf32>
    %c0_11 = arith.constant 0 : index
    %c0_12 = arith.constant 0 : index
    %14 = vector.load %arg6[%c0_11, %c0_12] : memref<8x512xf32, #tpu.memory_space<vmem>>, vector<8x512xf32>
    tpu.vector_store %arg6[%c0_11, %c0_12], %13 {strides = array<i32>} : memref<8x512xf32, #tpu.memory_space<vmem>>, vector<8x512xf32>,
    return
  }
  func.func @transform_0(%arg0: i32) -> (i32, i32) {
    %c0_i32 = arith.constant 0 : i32
    %c0_i32_0 = arith.constant 0 : i32
    return %arg0, %c0_i32 : i32, i32
  }
  func.func @transform_1(%arg0: i32) -> (i32, i32) {
    %c0_i32 = arith.constant 0 : i32
    %c0_i32_0 = arith.constant 0 : i32
    %c0_i32_1 = arith.constant 0 : i32
    return %c0_i32, %c0_i32_0 : i32, i32
  }
  func.func @transform_2(%arg0: i32) -> (i32, i32) {
    %c0_i32 = arith.constant 0 : i32
    %c0_i32_0 = arith.constant 0 : i32
    %c0_i32_1 = arith.constant 0 : i32
    return %c0_i32, %c0_i32_0 : i32, i32
  }
  func.func @transform_3(%arg0: i32) -> (i32, i32) {
    %c0_i32 = arith.constant 0 : i32
    %c0_i32_0 = arith.constant 0 : i32
    %c0_i32_1 = arith.constant 0 : i32
    return %c0_i32, %c0_i32_0 : i32, i32
  }
  func.func @transform_4(%arg0: i32) -> (i32, i32) {
    %c0_i32 = arith.constant 0 : i32
    %c0_i32_0 = arith.constant 0 : i32
    %c0_i32_1 = arith.constant 0 : i32
    return %c0_i32, %c0_i32_0 : i32, i32
  }
  func.func @transform_5(%arg0: i32) -> (i32, i32) {
    %c0_i32 = arith.constant 0 : i32
    %c0_i32_0 = arith.constant 0 : i32
    return %arg0, %c0_i32 : i32, i32
  }
}

</mosaic_0001>

<bundles_post_ra>
// kernel: tpu_custom_call.1
= control target key start
LH: loop header
LB: loop body
LE: loop exit
PB: predicated region body
PF: predicated region fallthrough
CT: control target
= control target key end

     0   :  { %10 = vsyncpa [#allocation3], 0  ;;  %s3662_s0 = inlined_call_operand.hbm [shape: bf16[8,512], index: 0, kind: input, shape index: {}]   ;;  %s3663_s1 = inlined_call_operand.hbm [shape: bf16[512,512], index: 1, kind: input, shape index: {}]   ;;  %s3664_s2 = inlined_call_operand.hbm [shape: f32[1,512], index: 2, kind: input, shape index: {}]   ;;  %s3665_s3 = inlined_call_operand.hbm [shape: bf16[512,512], index: 3, kind: input, shape index: {}]   ;;  %s3666_s4 = inlined_call_operand.hbm [shape: f32[1,512], index: 4, kind: input, shape index: {}]   ;;  %s3667_s5 = inlined_call_operand.hbm [shape: f32[8,512], index: 5, kind: output, shape index: {}]  }
   0x1   :  { %11 = vsyncpa [#allocation6], 0 }
   0x2   :  { %12 = vsyncpa [#allocation9], 0  ;;  %s29_s20 = sshll.u32 %s3663_s1, 4  ;;  %s30_s20 = int_to_ptr.hbm [resolvable:$true] %s29_s20 }
   0x3   :  { %13 = vsyncpa [#allocation4], 0  ;;  %s3552_s21 = smov [#allocation5]   ;;  %s53_s25 = sshll.u32 %s3665_s3, 4  ;;  %s54_s25 = int_to_ptr.hbm [resolvable:$true] %s53_s25 }
   0x4   :  { %s31_s22 = sshll.u32 %s3552_s21, 4  ;;  %s3553_s26 = smov 256   ;;  %s32_s22 = int_to_ptr.vmem [resolvable:$true] %s31_s22 }
   0x5   :  { %s3554_s27 = smov 16   ;;  %s3555_s28 = smov [#allocation8]  }
   0x6   :  { %37 = dma.hbm_to_vmem [thread:$0]  %s30_s20, 16384, %s32_s22, [#allocation6], %s3553_s26, %s3553_s26, %s3554_s27  }
   0x7   :  { %s55_s29 = sshll.u32 %s3555_s28, 4  ;;  %s19_s7 = sshll.u32 %s3662_s0, 4  ;;  %s56_s29 = int_to_ptr.vmem [resolvable:$true] %s55_s29  ;;  %s20_s7 = int_to_ptr.hbm [resolvable:$true] %s19_s7 }
   0x8   :  { %61 = dma.hbm_to_vmem [thread:$0]  %s54_s25, 16384, %s56_s29, [#allocation9], %s3553_s26, %s3553_s26, %s3554_s27  }
   0x9   :  { %s43_s9 = sshll.u32 %s3664_s2, 4  ;;  %s3556_s10 = smov [#allocation2]   ;;  %s44_s9 = int_to_ptr.hbm [resolvable:$true] %s43_s9 }
   0xa   :  { %s21_s11 = sshll.u32 %s3556_s10, 4  ;;  %s3557_s3 = smov [#allocation7]   ;;  %s22_s11 = int_to_ptr.vmem [resolvable:$true] %s21_s11 }
   0xb   :  { %24 = dma.hbm_to_vmem [thread:$0]  %s20_s7, 256, %s22_s11, [#allocation3]  }
   0xc   :  { %s45_s12 = sshll.u32 %s3557_s3, 4  ;;  %s67_s15 = sshll.u32 %s3666_s4, 4  ;;  %s46_s12 = int_to_ptr.vmem [resolvable:$true] %s45_s12  ;;  %s68_s15 = int_to_ptr.hbm [resolvable:$true] %s67_s15 }
   0xd   :  { %48 = dma.hbm_to_vmem [thread:$0]  %s44_s9, 64, %s46_s12, [#allocation6]  }
   0xe   :  { %s3558_s0 = smov [#allocation10]  }
   0xf   :  { %s69_s16 = sshll.u32 %s3558_s0, 4  ;;  %s70_s16 = int_to_ptr.vmem [resolvable:$true] %s69_s16 }
  0x10   :  { %72 = dma.hbm_to_vmem [thread:$0]  %s68_s15, 64, %s70_s16, [#allocation9]  }
  0x11   :  { %3544 = dma.done.wait [#allocation3], 256  }
  0x12   :  { %3545 = vsyncadd [#allocation3], 4294967040 }
  0x13   :  { %3546 = dma.done.wait [#allocation6], 16448  }
  0x14   :  { %3547 = vsyncadd [#allocation6], 4294950848 }
  0x15   :  { %3548 = dma.done.wait [#allocation9], 16448  }
  0x16   :  { %3549 = vsyncadd [#allocation9], 4294950848  ;;  %v2226_v0 = vld [vmem:[#allocation5 + $0xe0] sm:$0xf]  ;;  %v3166_v1 = vld [vmem:[#allocation5 + $0xec] sm:$0xf0] }
  0x17   :  { %v2354_v2 = vld [vmem:[#allocation5 + $0x1e0] sm:$0xf]  ;;  %v2227_v3 = vor.u32 %v3166_v1, %v2226_v0  ;;  %v3198_v4 = vld [vmem:[#allocation5 + $0x1ec] sm:$0xf0]  ;;  %s3559_s2 = smov [#allocation11]   ;;  %s2100_s19 = sshll.u32 %s3667_s5, 4  ;;  %s2101_s19 = int_to_ptr.hbm [resolvable:$true] %s2100_s19 }
  0x18   :  { %v2482_v5 = vld [vmem:[#allocation5 + $0x2e0] sm:$0xf]  ;;  %v3230_v6 = vld [vmem:[#allocation5 + $0x2ec] sm:$0xf0]  ;;  %v2355_v7 = vor.u32 %v3198_v4, %v2354_v2  ;;  %s2098_s4 = sshll.u32 %s3559_s2, 4  ;;  %s2099_s4 = int_to_ptr.vmem [resolvable:$true] %s2098_s4 }
  0x19   :  { %v2483_v8 = vor.u32 %v3230_v6, %v2482_v5  ;;  %v2610_v9 = vld [vmem:[#allocation5 + $0x3e0] sm:$0xf]  ;;  %v3262_v10 = vld [vmem:[#allocation5 + $0x3ec] sm:$0xf0]  ;;  %887 = vmatpush.bf16.msra.mxu0 %v2227_v3 }
  0x1a   :  { %v2210_v11 = vld [vmem:[#allocation5 + $0xc0] sm:$0xf]  ;;  %v2611_v12 = vor.u32 %v3262_v10, %v2610_v9  ;;  %v3162_v13 = vld [vmem:[#allocation5 + $0xcc] sm:$0xf0]  ;;  %900 = vmatpush.bf16.msra.mxu1 %v2355_v7 }
  0x1b   :  { %v2338_v14 = vld [vmem:[#allocation5 + $0x1c0] sm:$0xf]  ;;  %v3194_v15 = vld [vmem:[#allocation5 + $0x1cc] sm:$0xf0]  ;;  %913 = vmatpush.bf16.msra.mxu2 %v2483_v8  ;;  %v2211_v16 = vor.u32 %v3162_v13, %v2210_v11 }
  0x1c   :  { %v2339_v17 = vor.u32 %v3194_v15, %v2338_v14  ;;  %v2466_v18 = vld [vmem:[#allocation5 + $0x2c0] sm:$0xf]  ;;  %v3226_v19 = vld [vmem:[#allocation5 + $0x2cc] sm:$0xf0]  ;;  %926 = vmatpush.bf16.msra.mxu3 %v2611_v12 }
  0x1d   :  { %v2594_v20 = vld [vmem:[#allocation5 + $0x3c0] sm:$0xf]  ;;  %v2467_v21 = vor.u32 %v3226_v19, %v2466_v18  ;;  %v3258_v22 = vld [vmem:[#allocation5 + $0x3cc] sm:$0xf0]  ;;  %888 = vmatpush.bf16.msra.mxu0 %v2211_v16 }
  0x1e   :  { %v2194_v23 = vld [vmem:[#allocation5 + $0xa0] sm:$0xf]  ;;  %v3158_v24 = vld [vmem:[#allocation5 + $0xac] sm:$0xf0]  ;;  %v2595_v25 = vor.u32 %v3258_v22, %v2594_v20  ;;  %901 = vmatpush.bf16.msra.mxu1 %v2339_v17 }
  0x1f   :  { %v2322_v26 = vld [vmem:[#allocation5 + $0x1a0] sm:$0xf]  ;;  %v3190_v27 = vld [vmem:[#allocation5 + $0x1ac] sm:$0xf0]  ;;  %v2195_v29 = vor.u32 %v3158_v24, %v2194_v23  ;;  %914 = vmatpush.bf16.msra.mxu2 %v2467_v21 }
  0x20   :  { %v2450_v28 = vld [vmem:[#allocation5 + $0x2a0] sm:$0xf]  ;;  %v3222_v30 = vld [vmem:[#allocation5 + $0x2ac] sm:$0xf0]  ;;  %v2323_v33 = vor.u32 %v3190_v27, %v2322_v26  ;;  %927 = vmatpush.bf16.msra.mxu3 %v2595_v25  ;;  %v94_v25 = vld [vmem:[#allocation2 + $0x8] sm:$0xff] }
  0x21   :  { %v2578_v31 = vld [vmem:[#allocation5 + $0x3a0] sm:$0xf]  ;;  %v3254_v32 = vld [vmem:[#allocation5 + $0x3ac] sm:$0xf0]  ;;  %v2451_v34 = vor.u32 %v3222_v30, %v2450_v28  ;;  %889 = vmatpush.bf16.msra.mxu0 %v2195_v29  ;;  %v3164_v29 = vld [vmem:[#allocation5 + $0xe4] sm:$0xf] }
  0x22   :  { %v2178_v35 = vld [vmem:[#allocation5 + $0x80] sm:$0xf]  ;;  %v3154_v36 = vld [vmem:[#allocation5 + $0x8c] sm:$0xf0]  ;;  %v2579_v38 = vor.u32 %v3254_v32, %v2578_v31  ;;  %902 = vmatpush.bf16.msra.mxu1 %v2323_v33  ;;  %v2228_v30 = vld [vmem:[#allocation5 + $0xf0] sm:$0xf0] }
  0x23   :  { %v2306_v37 = vld [vmem:[#allocation5 + $0x180] sm:$0xf]  ;;  %v3186_v39 = vld [vmem:[#allocation5 + $0x18c] sm:$0xf0]  ;;  %v2179_v44 = vor.u32 %v3154_v36, %v2178_v35  ;;  %915 = vmatpush.bf16.msra.mxu2 %v2451_v34  ;;  %v3196_v31 = vld [vmem:[#allocation5 + $0x1e4] sm:$0xf]  ;;  %v237_v36 = vunpack.c.l.b16 %v94_v25 }
  0x24   :  { %v2434_v40 = vld [vmem:[#allocation5 + $0x280] sm:$0xf]  ;;  %v3218_v41 = vld [vmem:[#allocation5 + $0x28c] sm:$0xf0]  ;;  %v2307_v45 = vor.u32 %v3186_v39, %v2306_v37  ;;  %928 = vmatpush.bf16.msra.mxu3 %v2579_v38  ;;  %v2356_v32 = vld [vmem:[#allocation5 + $0x1f0] sm:$0xf0] }
  0x25   :  { %v2562_v42 = vld [vmem:[#allocation5 + $0x380] sm:$0xf]  ;;  %v3250_v43 = vld [vmem:[#allocation5 + $0x38c] sm:$0xf0]  ;;  %v2435_v46 = vor.u32 %v3218_v41, %v2434_v40  ;;  %890 = vmatpush.bf16.msra.mxu0 %v2179_v44  ;;  %v3228_v34 = vld [vmem:[#allocation5 + $0x2e4] sm:$0xf] }
  0x26   :  { %v2162_v47 = vld [vmem:[#allocation5 + $0x60] sm:$0xf]  ;;  %v3150_v48 = vld [vmem:[#allocation5 + $0x6c] sm:$0xf0]  ;;  %v2563_v50 = vor.u32 %v3250_v43, %v2562_v42  ;;  %903 = vmatpush.bf16.msra.mxu1 %v2307_v45  ;;  %v2484_v35 = vld [vmem:[#allocation5 + $0x2f0] sm:$0xf0]  ;;  %v238_v43 = vunpack.c.h.b16 %v94_v25  ;;  %v2231_v45 = vor.u32 %v3164_v29, %v2228_v30 }
  0x27   :  { %v2290_v49 = vld [vmem:[#allocation5 + $0x160] sm:$0xf]  ;;  %v3182_v51 = vld [vmem:[#allocation5 + $0x16c] sm:$0xf0]  ;;  %v2163_v56 = vor.u32 %v3150_v48, %v2162_v47  ;;  %916 = vmatpush.bf16.msra.mxu2 %v2435_v46  ;;  %v3260_v40 = vld [vmem:[#allocation5 + $0x3e4] sm:$0xf]  ;;  %v2359_v47 = vor.u32 %v3196_v31, %v2356_v32  ;;  %v2487_v48 = vor.u32 %v3228_v34, %v2484_v35 }
  0x28   :  { %v2418_v52 = vld [vmem:[#allocation5 + $0x260] sm:$0xf]  ;;  %v3214_v53 = vld [vmem:[#allocation5 + $0x26c] sm:$0xf0]  ;;  %v2291_v57 = vor.u32 %v3182_v51, %v2290_v49  ;;  %929 = vmatpush.bf16.msra.mxu3 %v2563_v50  ;;  %v2612_v41 = vld [vmem:[#allocation5 + $0x3f0] sm:$0xf0] }
  0x29   :  { %v2546_v54 = vld [vmem:[#allocation5 + $0x360] sm:$0xf]  ;;  %v3246_v55 = vld [vmem:[#allocation5 + $0x36c] sm:$0xf0]  ;;  %v2419_v58 = vor.u32 %v3214_v53, %v2418_v52  ;;  %891 = vmatpush.bf16.msra.mxu0 %v2163_v56  ;;  %v3160_v49 = vld [vmem:[#allocation5 + $0xc4] sm:$0xf]  ;;  %v2615_v52 = vor.u32 %v3260_v40, %v2612_v41  ;;  %v3605_v53 = vpack.c.b16 %v237_v36, %v237_v36 }
  0x2a   :  { %v2146_v59 = vld [vmem:[#allocation5 + $0x40] sm:$0xf]  ;;  %v3146_v60 = vld [vmem:[#allocation5 + $0x4c] sm:$0xf0]  ;;  %v2547_v62 = vor.u32 %v3246_v55, %v2546_v54  ;;  %904 = vmatpush.bf16.msra.mxu1 %v2291_v57  ;;  %v2212_v50 = vld [vmem:[#allocation5 + $0xd0] sm:$0xf0] }
  0x2b   :  { %v2274_v61 = vld [vmem:[#allocation5 + $0x140] sm:$0xf]  ;;  %v3178_v63 = vld [vmem:[#allocation5 + $0x14c] sm:$0xf0]  ;;  %v2147_v4 = vor.u32 %v3146_v60, %v2146_v59  ;;  %917 = vmatpush.bf16.msra.mxu2 %v2419_v58  ;;  %v3192_v51 = vld [vmem:[#allocation5 + $0x1c4] sm:$0xf]  ;;  %v3609_v60 = vpack.c.b16 %v238_v43, %v238_v43 }
  0x2c   :  { %v2402_v0 = vld [vmem:[#allocation5 + $0x240] sm:$0xf]  ;;  %v3210_v1 = vld [vmem:[#allocation5 + $0x24c] sm:$0xf0]  ;;  %v2275_v5 = vor.u32 %v3178_v63, %v2274_v61  ;;  %930 = vmatpush.bf16.msra.mxu3 %v2547_v62  ;;  %v2340_v54 = vld [vmem:[#allocation5 + $0x1d0] sm:$0xf0]  ;;  %v2215_v61 = vor.u32 %v3160_v49, %v2212_v50 }
  0x2d   :  { %v2530_v2 = vld [vmem:[#allocation5 + $0x340] sm:$0xf]  ;;  %v3242_v3 = vld [vmem:[#allocation5 + $0x34c] sm:$0xf0]  ;;  %v2403_v6 = vor.u32 %v3210_v1, %v2402_v0  ;;  %892 = vmatpush.bf16.msra.mxu0 %v2147_v4  ;;  %v3224_v55 = vld [vmem:[#allocation5 + $0x2c4] sm:$0xf]  ;;  %v2343_v63 = vor.u32 %v3192_v51, %v2340_v54 }
  0x2e   :  { %v2130_v7 = vld [vmem:[#allocation5 + $0x20] sm:$0xf]  ;;  %v3142_v8 = vld [vmem:[#allocation5 + $0x2c] sm:$0xf0]  ;;  %v2531_v10 = vor.u32 %v3242_v3, %v2530_v2  ;;  %905 = vmatpush.bf16.msra.mxu1 %v2275_v5  ;;  %v2468_v56 = vld [vmem:[#allocation5 + $0x2d0] sm:$0xf0] }
  0x2f   :  { %v2258_v9 = vld [vmem:[#allocation5 + $0x120] sm:$0xf]  ;;  %v3174_v11 = vld [vmem:[#allocation5 + $0x12c] sm:$0xf0]  ;;  %v2131_v17 = vor.u32 %v3142_v8, %v2130_v7  ;;  %918 = vmatpush.bf16.msra.mxu2 %v2403_v6  ;;  %v3256_v57 = vld [vmem:[#allocation5 + $0x3c4] sm:$0xf]  ;;  %v2471_v0 = vor.u32 %v3224_v55, %v2468_v56 }
  0x30   :  { %v2386_v12 = vld [vmem:[#allocation5 + $0x220] sm:$0xf]  ;;  %v3206_v13 = vld [vmem:[#allocation5 + $0x22c] sm:$0xf0]  ;;  %v2259_v21 = vor.u32 %v3174_v11, %v2258_v9  ;;  %931 = vmatpush.bf16.msra.mxu3 %v2531_v10  ;;  %v2596_v58 = vld [vmem:[#allocation5 + $0x3d0] sm:$0xf0] }
  0x31   :  { %v2514_v14 = vld [vmem:[#allocation5 + $0x320] sm:$0xf]  ;;  %v3238_v15 = vld [vmem:[#allocation5 + $0x32c] sm:$0xf0]  ;;  %v2387_v22 = vor.u32 %v3206_v13, %v2386_v12  ;;  %893 = vmatpush.bf16.msra.mxu0 %v2131_v17  ;;  %v3156_v1 = vld [vmem:[#allocation5 + $0xa4] sm:$0xf]  ;;  %v2599_v4 = vor.u32 %v3256_v57, %v2596_v58 }
  0x32   :  { %v2114_v16 = vld [vmem:[#allocation5] sm:$0xf]  ;;  %v3138_v18 = vld [vmem:[#allocation5 + $0xc] sm:$0xf0]  ;;  %v2515_v26 = vor.u32 %v3238_v15, %v2514_v14  ;;  %906 = vmatpush.bf16.msra.mxu1 %v2259_v21  ;;  %v2196_v2 = vld [vmem:[#allocation5 + $0xb0] sm:$0xf0] }
  0x33   :  { %v2242_v19 = vld [vmem:[#allocation5 + $0x100] sm:$0xf]  ;;  %v3170_v20 = vld [vmem:[#allocation5 + $0x10c] sm:$0xf0]  ;;  %v2115_v33 = vor.u32 %v3138_v18, %v2114_v16  ;;  %919 = vmatpush.bf16.msra.mxu2 %v2387_v22  ;;  %v3188_v3 = vld [vmem:[#allocation5 + $0x1a4] sm:$0xf]  ;;  %v2199_v10 = vor.u32 %v3156_v1, %v2196_v2 }
  0x34   :  { %v2370_v23 = vld [vmem:[#allocation5 + $0x200] sm:$0xf]  ;;  %v3202_v24 = vld [vmem:[#allocation5 + $0x20c] sm:$0xf0]  ;;  %v2243_v38 = vor.u32 %v3170_v20, %v2242_v19  ;;  %932 = vmatpush.bf16.msra.mxu3 %v2515_v26  ;;  %v2324_v5 = vld [vmem:[#allocation5 + $0x1b0] sm:$0xf0] }
  0x35   :  { %v2498_v27 = vld [vmem:[#allocation5 + $0x300] sm:$0xf]  ;;  %v3234_v28 = vld [vmem:[#allocation5 + $0x30c] sm:$0xf0]  ;;  %v2371_v39 = vor.u32 %v3202_v24, %v2370_v23  ;;  %894 = vmatpush.bf16.msra.mxu0 %v2115_v33  ;;  %v3220_v6 = vld [vmem:[#allocation5 + $0x2a4] sm:$0xf]  ;;  %v2327_v11 = vor.u32 %v3188_v3, %v2324_v5 }
  0x36   :  { %v93_v37 = vld [vmem:[#allocation2] sm:$0xff]  ;;  %v2499_v44 = vor.u32 %v3234_v28, %v2498_v27  ;;  %907 = vmatpush.bf16.msra.mxu1 %v2243_v38  ;;  %v3252_v8 = vld [vmem:[#allocation5 + $0x3a4] sm:$0xf] }
  0x37   :  { %v235_v42 = vunpack.c.l.b16 %v93_v37  ;;  %v236_v46 = vunpack.c.h.b16 %v93_v37  ;;  %920 = vmatpush.bf16.msra.mxu2 %v2371_v39  ;;  %v2452_v7 = vld [vmem:[#allocation5 + $0x2b0] sm:$0xf0]  ;;  %v3152_v13 = vld [vmem:[#allocation5 + $0x84] sm:$0xf] }
  0x38   :  { %933 = vmatpush.bf16.msra.mxu3 %v2499_v44  ;;  %v2580_v9 = vld [vmem:[#allocation5 + $0x3b0] sm:$0xf0]  ;;  %v2455_v12 = vor.u32 %v3220_v6, %v2452_v7  ;;  %v3184_v15 = vld [vmem:[#allocation5 + $0x184] sm:$0xf] }
  0x39   :  { %v3607_v59 = vpack.c.b16 %v235_v42, %v235_v42  ;;  %939 = vmatpush.bf16.msrb.mxu0 %v2231_v45  ;;  %v3611_v62 = vpack.c.b16 %v236_v46, %v236_v46  ;;  %v2180_v14 = vld [vmem:[#allocation5 + $0x90] sm:$0xf0]  ;;  %v2583_v16 = vor.u32 %v3252_v8, %v2580_v9  ;;  %v3216_v18 = vld [vmem:[#allocation5 + $0x284] sm:$0xf] }
  0x3a   :  { %952 = vmatpush.bf16.msrb.mxu1 %v2359_v47  ;;  %921 = vmatmul.bf16.vlgmr.msra.gmra.mxu2 %v3605_v53  ;;  %v2308_v17 = vld [vmem:[#allocation5 + $0x190] sm:$0xf0]  ;;  %v3248_v20 = vld [vmem:[#allocation5 + $0x384] sm:$0xf]  ;;  %v2183_v22 = vor.u32 %v3152_v13, %v2180_v14  ;;  %v3199_v14 = vld [vmem:[#allocation5 + $0x1f4] sm:$0xf0] }
  0x3b   :  { %965 = vmatpush.bf16.msrb.mxu2 %v2487_v48  ;;  %895 = vmatmul.bf16.vlgmr.msra.gmra.mxu0 %v3607_v59  ;;  %v2436_v19 = vld [vmem:[#allocation5 + $0x290] sm:$0xf0]  ;;  %v2311_v23 = vor.u32 %v3184_v15, %v2308_v17  ;;  %v3148_v25 = vld [vmem:[#allocation5 + $0x64] sm:$0xf]  ;;  %v2490_v15 = vld [vmem:[#allocation5 + $0x2e8] sm:$0xf] }
  0x3c   :  { %978 = vmatpush.bf16.msrb.mxu3 %v2615_v52  ;;  %908 = vmatmul.bf16.vlgmr.msra.gmra.mxu1 %v3611_v62  ;;  %v2564_v21 = vld [vmem:[#allocation5 + $0x390] sm:$0xf0]  ;;  %v2439_v24 = vor.u32 %v3216_v18, %v2436_v19  ;;  %v3180_v27 = vld [vmem:[#allocation5 + $0x164] sm:$0xf]  ;;  %v2618_v19 = vld [vmem:[#allocation5 + $0x3e8] sm:$0xf] }
  0x3d   :  { %934 = vmatmul.bf16.vlgmr.msra.gmra.mxu3 %v3609_v60  ;;  %940 = vmatpush.bf16.msrb.mxu0 %v2215_v61  ;;  %v2164_v26 = vld [vmem:[#allocation5 + $0x70] sm:$0xf0]  ;;  %v2567_v28 = vor.u32 %v3248_v20, %v2564_v21  ;;  %v3212_v30 = vld [vmem:[#allocation5 + $0x264] sm:$0xf]  ;;  %v3263_v20 = vld [vmem:[#allocation5 + $0x3f4] sm:$0xf0] }
  0x3e   :  { %953 = vmatpush.bf16.msrb.mxu1 %v2343_v63  ;;  %v2292_v29 = vld [vmem:[#allocation5 + $0x170] sm:$0xf0]  ;;  %v3244_v32 = vld [vmem:[#allocation5 + $0x364] sm:$0xf]  ;;  %v2167_v34 = vor.u32 %v3148_v25, %v2164_v26  ;;  %v2218_v25 = vld [vmem:[#allocation5 + $0xc8] sm:$0xf] }
  0x3f   :  { %966 = vmatpush.bf16.msrb.mxu2 %v2471_v0  ;;  %v2420_v31 = vld [vmem:[#allocation5 + $0x270] sm:$0xf0]  ;;  %v2295_v35 = vor.u32 %v3180_v27, %v2292_v29  ;;  %v3144_v37 = vld [vmem:[#allocation5 + $0x44] sm:$0xf]  ;;  %v3163_v26 = vld [vmem:[#allocation5 + $0xd4] sm:$0xf0] }
  0x40   :  { %979 = vmatpush.bf16.msrb.mxu3 %v2599_v4  ;;  %v2548_v33 = vld [vmem:[#allocation5 + $0x370] sm:$0xf0]  ;;  %v2423_v36 = vor.u32 %v3212_v30, %v2420_v31  ;;  %v3176_v39 = vld [vmem:[#allocation5 + $0x144] sm:$0xf]  ;;  %v2346_v27 = vld [vmem:[#allocation5 + $0x1c8] sm:$0xf] }
  0x41   :  { %941 = vmatpush.bf16.msrb.mxu0 %v2199_v10  ;;  %v2148_v38 = vld [vmem:[#allocation5 + $0x50] sm:$0xf0]  ;;  %v2551_v40 = vor.u32 %v3244_v32, %v2548_v33  ;;  %v3208_v42 = vld [vmem:[#allocation5 + $0x244] sm:$0xf]  ;;  %v2234_v10 = vld [vmem:[#allocation5 + $0xe8] sm:$0xf] }
  0x42   :  { %954 = vmatpush.bf16.msrb.mxu1 %v2327_v11  ;;  %v2276_v41 = vld [vmem:[#allocation5 + $0x150] sm:$0xf0]  ;;  %v3240_v44 = vld [vmem:[#allocation5 + $0x344] sm:$0xf]  ;;  %v2151_v46 = vor.u32 %v3144_v37, %v2148_v38  ;;  %v3167_v11 = vld [vmem:[#allocation5 + $0xf4] sm:$0xf0] }
  0x43   :  { %967 = vmatpush.bf16.msrb.mxu2 %v2455_v12  ;;  %v2404_v43 = vld [vmem:[#allocation5 + $0x250] sm:$0xf0]  ;;  %v2279_v47 = vor.u32 %v3176_v39, %v2276_v41  ;;  %v3140_v49 = vld [vmem:[#allocation5 + $0x24] sm:$0xf]  ;;  %v2362_v12 = vld [vmem:[#allocation5 + $0x1e8] sm:$0xf] }
  0x44   :  { %980 = vmatpush.bf16.msrb.mxu3 %v2583_v16  ;;  %v2532_v45 = vld [vmem:[#allocation5 + $0x350] sm:$0xf0]  ;;  %v2407_v48 = vor.u32 %v3208_v42, %v2404_v43  ;;  %v3172_v51 = vld [vmem:[#allocation5 + $0x124] sm:$0xf]  ;;  %v3231_v16 = vld [vmem:[#allocation5 + $0x2f4] sm:$0xf0] }
  0x45   :  { %942 = vmatpush.bf16.msrb.mxu0 %v2183_v22  ;;  %v2132_v50 = vld [vmem:[#allocation5 + $0x30] sm:$0xf0]  ;;  %v2535_v52 = vor.u32 %v3240_v44, %v2532_v45  ;;  %v3204_v55 = vld [vmem:[#allocation5 + $0x224] sm:$0xf]  ;;  %v2235_v22 = vor.u32 %v3167_v11, %v2234_v10  ;;  %v3195_v29 = vld [vmem:[#allocation5 + $0x1d4] sm:$0xf0] }
  0x46   :  { %955 = vmatpush.bf16.msrb.mxu1 %v2311_v23  ;;  %v2260_v54 = vld [vmem:[#allocation5 + $0x130] sm:$0xf0]  ;;  %v3236_v57 = vld [vmem:[#allocation5 + $0x324] sm:$0xf]  ;;  %v2135_v61 = vor.u32 %v3140_v49, %v2132_v50  ;;  %v2363_v23 = vor.u32 %v3199_v14, %v2362_v12  ;;  %v2474_v30 = vld [vmem:[#allocation5 + $0x2c8] sm:$0xf] }
  0x47   :  { %968 = vmatpush.bf16.msrb.mxu2 %v2439_v24  ;;  %v2388_v56 = vld [vmem:[#allocation5 + $0x230] sm:$0xf0]  ;;  %v3136_v63 = vld [vmem:[#allocation5 + $0x4] sm:$0xf]  ;;  %v2263_v1 = vor.u32 %v3172_v51, %v2260_v54  ;;  %v2491_v24 = vor.u32 %v3231_v16, %v2490_v15  ;;  %v3227_v31 = vld [vmem:[#allocation5 + $0x2d4] sm:$0xf0] }
  0x48   :  { %981 = vmatpush.bf16.msrb.mxu3 %v2567_v28  ;;  %v2516_v58 = vld [vmem:[#allocation5 + $0x330] sm:$0xf0]  ;;  %v2391_v2 = vor.u32 %v3204_v55, %v2388_v56  ;;  %v3168_v3 = vld [vmem:[#allocation5 + $0x104] sm:$0xf]  ;;  %v2619_v28 = vor.u32 %v3263_v20, %v2618_v19  ;;  %v2602_v32 = vld [vmem:[#allocation5 + $0x3c8] sm:$0xf] }
  0x49   :  { %943 = vmatpush.bf16.msrb.mxu0 %v2167_v34  ;;  %v2116_v0 = vld [vmem:[#allocation5 + $0x10] sm:$0xf0]  ;;  %v3200_v5 = vld [vmem:[#allocation5 + $0x204] sm:$0xf]  ;;  %v2519_v6 = vor.u32 %v3236_v57, %v2516_v58  ;;  %v3259_v33 = vld [vmem:[#allocation5 + $0x3d4] sm:$0xf0]  ;;  %v2219_v34 = vor.u32 %v3163_v26, %v2218_v25 }
  0x4a   :  { %956 = vmatpush.bf16.msrb.mxu1 %v2295_v35  ;;  %v2244_v4 = vld [vmem:[#allocation5 + $0x110] sm:$0xf0]  ;;  %v3232_v8 = vld [vmem:[#allocation5 + $0x304] sm:$0xf]  ;;  %v2119_v13 = vor.u32 %v3136_v63, %v2116_v0  ;;  %v2347_v35 = vor.u32 %v3195_v29, %v2346_v27  ;;  %v2202_v37 = vld [vmem:[#allocation5 + $0xa8] sm:$0xf] }
  0x4b   :  { %969 = vmatpush.bf16.msrb.mxu2 %v2423_v36  ;;  %v2372_v7 = vld [vmem:[#allocation5 + $0x210] sm:$0xf0]  ;;  %v2247_v17 = vor.u32 %v3168_v3, %v2244_v4  ;;  %v2475_v36 = vor.u32 %v3227_v31, %v2474_v30  ;;  %v3159_v38 = vld [vmem:[#allocation5 + $0xb4] sm:$0xf0]  ;;  %v2330_v39 = vld [vmem:[#allocation5 + $0x1a8] sm:$0xf] }
  0x4c   :  { %982 = vmatpush.bf16.msrb.mxu3 %v2551_v40  ;;  %v2500_v9 = vld [vmem:[#allocation5 + $0x310] sm:$0xf0]  ;;  %v2375_v18 = vor.u32 %v3200_v5, %v2372_v7  ;;  %v2603_v40 = vor.u32 %v3259_v33, %v2602_v32  ;;  %v3191_v41 = vld [vmem:[#allocation5 + $0x1b4] sm:$0xf0]  ;;  %v2458_v42 = vld [vmem:[#allocation5 + $0x2a8] sm:$0xf] }
  0x4d   :  { %944 = vmatpush.bf16.msrb.mxu0 %v2151_v46  ;;  %v2503_v21 = vor.u32 %v3232_v8, %v2500_v9  ;;  %v3223_v43 = vld [vmem:[#allocation5 + $0x2b4] sm:$0xf0]  ;;  %v2586_v44 = vld [vmem:[#allocation5 + $0x3a8] sm:$0xf]  ;;  %v2203_v46 = vor.u32 %v3159_v38, %v2202_v37 }
  0x4e   :  { %957 = vmatpush.bf16.msrb.mxu1 %v2279_v47  ;;  %v3255_v45 = vld [vmem:[#allocation5 + $0x3b4] sm:$0xf0]  ;;  %v2331_v47 = vor.u32 %v3191_v41, %v2330_v39  ;;  %v2186_v49 = vld [vmem:[#allocation5 + $0x88] sm:$0xf] }
  0x4f   :  { %970 = vmatpush.bf16.msrb.mxu2 %v2407_v48  ;;  %v2459_v48 = vor.u32 %v3223_v43, %v2458_v42  ;;  %v3155_v50 = vld [vmem:[#allocation5 + $0x94] sm:$0xf0]  ;;  %v2314_v51 = vld [vmem:[#allocation5 + $0x188] sm:$0xf] }
  0x50   :  { %983 = vmatpush.bf16.msrb.mxu3 %v2535_v52  ;;  %v2587_v52 = vor.u32 %v3255_v45, %v2586_v44  ;;  %v3187_v54 = vld [vmem:[#allocation5 + $0x194] sm:$0xf0]  ;;  %v2442_v55 = vld [vmem:[#allocation5 + $0x288] sm:$0xf] }
  0x51   :  { %945 = vmatpush.bf16.msrb.mxu0 %v2135_v61  ;;  %v3219_v56 = vld [vmem:[#allocation5 + $0x294] sm:$0xf0]  ;;  %v2570_v57 = vld [vmem:[#allocation5 + $0x388] sm:$0xf]  ;;  %v2187_v61 = vor.u32 %v3155_v50, %v2186_v49  ;;  %v2315_v63 = vor.u32 %v3187_v54, %v2314_v51  ;;  %v2364_v50 = vld [vmem:[#allocation5 + $0x1f8] sm:$0xf0] }
  0x52   :  { %958 = vmatpush.bf16.msrb.mxu1 %v2263_v1  ;;  %v3251_v58 = vld [vmem:[#allocation5 + $0x394] sm:$0xf0]  ;;  %v2443_v0 = vor.u32 %v3219_v56, %v2442_v55  ;;  %v2170_v1 = vld [vmem:[#allocation5 + $0x68] sm:$0xf]  ;;  %v3229_v51 = vld [vmem:[#allocation5 + $0x2ec] sm:$0xf] }
  0x53   :  { %971 = vmatpush.bf16.msrb.mxu2 %v2391_v2  ;;  %v3151_v2 = vld [vmem:[#allocation5 + $0x74] sm:$0xf0]  ;;  %v2298_v3 = vld [vmem:[#allocation5 + $0x168] sm:$0xf]  ;;  %v2571_v4 = vor.u32 %v3251_v58, %v2570_v57  ;;  %v3261_v56 = vld [vmem:[#allocation5 + $0x3ec] sm:$0xf] }
  0x54   :  { %984 = vmatpush.bf16.msrb.mxu3 %v2519_v6  ;;  %v3183_v5 = vld [vmem:[#allocation5 + $0x174] sm:$0xf0]  ;;  %v2426_v6 = vld [vmem:[#allocation5 + $0x268] sm:$0xf]  ;;  %v2171_v10 = vor.u32 %v3151_v2, %v2170_v1  ;;  %v2620_v57 = vld [vmem:[#allocation5 + $0x3f8] sm:$0xf0] }
  0x55   :  { %946 = vmatpush.bf16.msrb.mxu0 %v2119_v13  ;;  %v3215_v7 = vld [vmem:[#allocation5 + $0x274] sm:$0xf0]  ;;  %v2554_v8 = vld [vmem:[#allocation5 + $0x368] sm:$0xf]  ;;  %v2299_v11 = vor.u32 %v3183_v5, %v2298_v3  ;;  %v3161_v1 = vld [vmem:[#allocation5 + $0xcc] sm:$0xf] }
  0x56   :  { %959 = vmatpush.bf16.msrb.mxu1 %v2247_v17  ;;  %v3247_v9 = vld [vmem:[#allocation5 + $0x374] sm:$0xf0]  ;;  %v2427_v12 = vor.u32 %v3215_v7, %v2426_v6  ;;  %v2154_v13 = vld [vmem:[#allocation5 + $0x48] sm:$0xf]  ;;  %v2220_v2 = vld [vmem:[#allocation5 + $0xd8] sm:$0xf0] }
  0x57   :  { %972 = vmatpush.bf16.msrb.mxu2 %v2375_v18  ;;  %v3147_v14 = vld [vmem:[#allocation5 + $0x54] sm:$0xf0]  ;;  %v2282_v15 = vld [vmem:[#allocation5 + $0x148] sm:$0xf]  ;;  %v2555_v16 = vor.u32 %v3247_v9, %v2554_v8  ;;  %v3193_v3 = vld [vmem:[#allocation5 + $0x1cc] sm:$0xf] }
  0x58   :  { %985 = vmatpush.bf16.msrb.mxu3 %v2503_v21  ;;  %947 = vmatmul.bf16.vlgmr.msrb.gmra.mxu0 %v3607_v59  ;;  %v3179_v17 = vld [vmem:[#allocation5 + $0x154] sm:$0xf0]  ;;  %v2410_v18 = vld [vmem:[#allocation5 + $0x248] sm:$0xf]  ;;  %v2348_v5 = vld [vmem:[#allocation5 + $0x1d8] sm:$0xf0] }
  0x59   :  { %991 = vmatpush.bf16.msra.mxu0 %v2235_v22  ;;  %960 = vmatmul.bf16.vlgmr.msrb.gmra.mxu1 %v3611_v62  ;;  %v3211_v19 = vld [vmem:[#allocation5 + $0x254] sm:$0xf0]  ;;  %v2538_v20 = vld [vmem:[#allocation5 + $0x348] sm:$0xf]  ;;  %v2155_v22 = vor.u32 %v3147_v14, %v2154_v13  ;;  %v3225_v6 = vld [vmem:[#allocation5 + $0x2cc] sm:$0xf] }
  0x5a   :  { %1004 = vmatpush.bf16.msra.mxu1 %v2363_v23  ;;  %973 = vmatmul.bf16.vlgmr.msrb.gmra.mxu2 %v3605_v53  ;;  %v3243_v21 = vld [vmem:[#allocation5 + $0x354] sm:$0xf0]  ;;  %v2283_v23 = vor.u32 %v3179_v17, %v2282_v15  ;;  %v2138_v25 = vld [vmem:[#allocation5 + $0x28] sm:$0xf]  ;;  %v2476_v7 = vld [vmem:[#allocation5 + $0x2d8] sm:$0xf0] }
  0x5b   :  { %1017 = vmatpush.bf16.msra.mxu2 %v2491_v24  ;;  %986 = vmatmul.bf16.vlgmr.msrb.gmra.mxu3 %v3609_v60  ;;  %v2411_v24 = vor.u32 %v3211_v19, %v2410_v18  ;;  %v3143_v26 = vld [vmem:[#allocation5 + $0x34] sm:$0xf0]  ;;  %v2266_v27 = vld [vmem:[#allocation5 + $0x128] sm:$0xf]  ;;  %v3257_v8 = vld [vmem:[#allocation5 + $0x3cc] sm:$0xf] }
  0x5c   :  { %1030 = vmatpush.bf16.msra.mxu3 %v2619_v28  ;;  %v2539_v28 = vor.u32 %v3243_v21, %v2538_v20  ;;  %v3175_v29 = vld [vmem:[#allocation5 + $0x134] sm:$0xf0]  ;;  %v2394_v30 = vld [vmem:[#allocation5 + $0x228] sm:$0xf]  ;;  %v2604_v9 = vld [vmem:[#allocation5 + $0x3d8] sm:$0xf0] }
  0x5d   :  { %992 = vmatpush.bf16.msra.mxu0 %v2219_v34  ;;  %v3207_v31 = vld [vmem:[#allocation5 + $0x234] sm:$0xf0]  ;;  %v2522_v32 = vld [vmem:[#allocation5 + $0x328] sm:$0xf]  ;;  %v2139_v34 = vor.u32 %v3143_v26, %v2138_v25  ;;  %v2267_v37 = vor.u32 %v3175_v29, %v2266_v27  ;;  %v3157_v13 = vld [vmem:[#allocation5 + $0xac] sm:$0xf] }
  0x5e   :  { %1005 = vmatpush.bf16.msra.mxu1 %v2347_v35  ;;  %v3239_v33 = vld [vmem:[#allocation5 + $0x334] sm:$0xf0]  ;;  %v2122_v35 = vld [vmem:[#allocation5 + $0x8] sm:$0xf]  ;;  %v2395_v38 = vor.u32 %v3207_v31, %v2394_v30  ;;  %v2204_v14 = vld [vmem:[#allocation5 + $0xb8] sm:$0xf0] }
  0x5f   :  { %1018 = vmatpush.bf16.msra.mxu2 %v2475_v36  ;;  %v3139_v36 = vld [vmem:[#allocation5 + $0x14] sm:$0xf0]  ;;  %v2250_v39 = vld [vmem:[#allocation5 + $0x108] sm:$0xf]  ;;  %v2523_v42 = vor.u32 %v3239_v33, %v2522_v32  ;;  %v3189_v15 = vld [vmem:[#allocation5 + $0x1ac] sm:$0xf] }
  0x60   :  { %1031 = vmatpush.bf16.msra.mxu3 %v2603_v40  ;;  %v3171_v40 = vld [vmem:[#allocation5 + $0x114] sm:$0xf0]  ;;  %v2378_v41 = vld [vmem:[#allocation5 + $0x208] sm:$0xf]  ;;  %v2123_v49 = vor.u32 %v3139_v36, %v2122_v35  ;;  %v2332_v17 = vld [vmem:[#allocation5 + $0x1b8] sm:$0xf0] }
  0x61   :  { %993 = vmatpush.bf16.msra.mxu0 %v2203_v46  ;;  %v3203_v43 = vld [vmem:[#allocation5 + $0x214] sm:$0xf0]  ;;  %v2506_v44 = vld [vmem:[#allocation5 + $0x308] sm:$0xf]  ;;  %v3165_v46 = vld [vmem:[#allocation5 + $0xec] sm:$0xf]  ;;  %v2251_v54 = vor.u32 %v3171_v40, %v2250_v39 }
  0x62   :  { %1006 = vmatpush.bf16.msra.mxu1 %v2331_v47  ;;  %v3235_v45 = vld [vmem:[#allocation5 + $0x314] sm:$0xf0]  ;;  %v2236_v47 = vld [vmem:[#allocation5 + $0xf8] sm:$0xf0]  ;;  %v2379_v55 = vor.u32 %v3203_v43, %v2378_v41  ;;  %v3221_v18 = vld [vmem:[#allocation5 + $0x2ac] sm:$0xf] }
  0x63   :  { %1019 = vmatpush.bf16.msra.mxu2 %v2459_v48  ;;  %v3197_v48 = vld [vmem:[#allocation5 + $0x1ec] sm:$0xf]  ;;  %v2507_v58 = vor.u32 %v3235_v45, %v2506_v44  ;;  %v2460_v19 = vld [vmem:[#allocation5 + $0x2b8] sm:$0xf0] }
  0x64   :  { %1032 = vmatpush.bf16.msra.mxu3 %v2587_v52  ;;  %v2492_v52 = vld [vmem:[#allocation5 + $0x2f8] sm:$0xf0]  ;;  %v3253_v20 = vld [vmem:[#allocation5 + $0x3ac] sm:$0xf] }
  0x65   :  { %994 = vmatpush.bf16.msra.mxu0 %v2187_v61  ;;  %v2239_v61 = vor.u32 %v3165_v46, %v2236_v47  ;;  %v2588_v21 = vld [vmem:[#allocation5 + $0x3b8] sm:$0xf0]  ;;  %v3153_v25 = vld [vmem:[#allocation5 + $0x8c] sm:$0xf] }
  0x66   :  { %1007 = vmatpush.bf16.msra.mxu1 %v2315_v63  ;;  %v2367_v63 = vor.u32 %v3197_v48, %v2364_v50  ;;  %v2188_v26 = vld [vmem:[#allocation5 + $0x98] sm:$0xf0]  ;;  %v3185_v27 = vld [vmem:[#allocation5 + $0x18c] sm:$0xf] }
  0x67   :  { %1020 = vmatpush.bf16.msra.mxu2 %v2443_v0  ;;  %v2495_v0 = vor.u32 %v3229_v51, %v2492_v52  ;;  %v2316_v29 = vld [vmem:[#allocation5 + $0x198] sm:$0xf0]  ;;  %v3217_v30 = vld [vmem:[#allocation5 + $0x28c] sm:$0xf] }
  0x68   :  { %1033 = vmatpush.bf16.msra.mxu3 %v2571_v4  ;;  %v2623_v4 = vor.u32 %v3261_v56, %v2620_v57  ;;  %v2444_v31 = vld [vmem:[#allocation5 + $0x298] sm:$0xf0]  ;;  %v3249_v32 = vld [vmem:[#allocation5 + $0x38c] sm:$0xf]  ;;  %v2319_v35 = vor.u32 %v3185_v27, %v2316_v29 }
  0x69   :  { %995 = vmatpush.bf16.msra.mxu0 %v2171_v10  ;;  %v2223_v10 = vor.u32 %v3161_v1, %v2220_v2  ;;  %v2572_v33 = vld [vmem:[#allocation5 + $0x398] sm:$0xf0]  ;;  %v2447_v36 = vor.u32 %v3217_v30, %v2444_v31  ;;  %v3181_v39 = vld [vmem:[#allocation5 + $0x16c] sm:$0xf]  ;;  %v2722_v31 = vld [vmem:[#allocation8 + $0xc0] sm:$0xf] }
  0x6a   :  { %1008 = vmatpush.bf16.msra.mxu1 %v2299_v11  ;;  %v2351_v11 = vor.u32 %v3193_v3, %v2348_v5  ;;  %v2575_v40 = vor.u32 %v3249_v32, %v2572_v33  ;;  %v2300_v41 = vld [vmem:[#allocation5 + $0x178] sm:$0xf0]  ;;  %v3245_v44 = vld [vmem:[#allocation5 + $0x36c] sm:$0xf]  ;;  %v3290_v32 = vld [vmem:[#allocation8 + $0xcc] sm:$0xf0] }
  0x6b   :  { %1021 = vmatpush.bf16.msra.mxu2 %v2427_v12  ;;  %v2479_v12 = vor.u32 %v3225_v6, %v2476_v7  ;;  %v2428_v43 = vld [vmem:[#allocation5 + $0x278] sm:$0xf0]  ;;  %v2303_v47 = vor.u32 %v3181_v39, %v2300_v41  ;;  %v3177_v51 = vld [vmem:[#allocation5 + $0x14c] sm:$0xf]  ;;  %v3318_v41 = vld [vmem:[#allocation8 + $0x1ac] sm:$0xf0] }
  0x6c   :  { %1034 = vmatpush.bf16.msra.mxu3 %v2555_v16  ;;  %v2607_v16 = vor.u32 %v3257_v8, %v2604_v9  ;;  %v2556_v45 = vld [vmem:[#allocation5 + $0x378] sm:$0xf0]  ;;  %v3241_v57 = vld [vmem:[#allocation5 + $0x34c] sm:$0xf] }
  0x6d   :  { %996 = vmatpush.bf16.msra.mxu0 %v2155_v22  ;;  %v2207_v22 = vor.u32 %v3157_v13, %v2204_v14  ;;  %v2156_v50 = vld [vmem:[#allocation5 + $0x58] sm:$0xf0]  ;;  %v2559_v52 = vor.u32 %v3245_v44, %v2556_v45  ;;  %v3141_v1 = vld [vmem:[#allocation5 + $0x2c] sm:$0xf]  ;;  %v3282_v44 = vld [vmem:[#allocation8 + $0x8c] sm:$0xf0] }
  0x6e   :  { %1009 = vmatpush.bf16.msra.mxu1 %v2283_v23  ;;  %v2335_v23 = vor.u32 %v3189_v15, %v2332_v17  ;;  %v2412_v56 = vld [vmem:[#allocation5 + $0x258] sm:$0xf0]  ;;  %v3173_v3 = vld [vmem:[#allocation5 + $0x12c] sm:$0xf] }
  0x6f   :  { %1022 = vmatpush.bf16.msra.mxu2 %v2411_v24  ;;  %v2463_v24 = vor.u32 %v3221_v18, %v2460_v19  ;;  %v2140_v2 = vld [vmem:[#allocation5 + $0x38] sm:$0xf0]  ;;  %v3205_v6 = vld [vmem:[#allocation5 + $0x22c] sm:$0xf] }
  0x70   :  { %1035 = vmatpush.bf16.msra.mxu3 %v2539_v28  ;;  %v2591_v28 = vor.u32 %v3253_v20, %v2588_v21  ;;  %v2268_v5 = vld [vmem:[#allocation5 + $0x138] sm:$0xf0]  ;;  %v3237_v8 = vld [vmem:[#allocation5 + $0x32c] sm:$0xf] }
  0x71   :  { %997 = vmatpush.bf16.msra.mxu0 %v2139_v34  ;;  %v2191_v34 = vor.u32 %v3153_v25, %v2188_v26  ;;  %v2396_v7 = vld [vmem:[#allocation5 + $0x238] sm:$0xf0]  ;;  %v3169_v15 = vld [vmem:[#allocation5 + $0x10c] sm:$0xf]  ;;  %v2866_v25 = vld [vmem:[#allocation8 + $0x1e0] sm:$0xf] }
  0x72   :  { %1010 = vmatpush.bf16.msra.mxu1 %v2267_v37  ;;  %v3149_v37 = vld [vmem:[#allocation5 + $0x6c] sm:$0xf]  ;;  %v2524_v9 = vld [vmem:[#allocation5 + $0x338] sm:$0xf0]  ;;  %v2399_v13 = vor.u32 %v3205_v6, %v2396_v7  ;;  %v3326_v26 = vld [vmem:[#allocation8 + $0x1ec] sm:$0xf0] }
  0x73   :  { %1023 = vmatpush.bf16.msra.mxu2 %v2395_v38  ;;  %v2172_v38 = vld [vmem:[#allocation5 + $0x78] sm:$0xf0]  ;;  %v2527_v17 = vor.u32 %v3237_v8, %v2524_v9  ;;  %v3201_v18 = vld [vmem:[#allocation5 + $0x20c] sm:$0xf]  ;;  %v2867_v33 = vor.u32 %v3326_v26, %v2866_v25  ;;  %v2994_v7 = vld [vmem:[#allocation8 + $0x2e0] sm:$0xf] }
  0x74   :  { %1036 = vmatpush.bf16.msra.mxu3 %v2523_v42  ;;  %v3213_v42 = vld [vmem:[#allocation5 + $0x26c] sm:$0xf]  ;;  %v2175_v46 = vor.u32 %v3149_v37, %v2172_v38  ;;  %v2124_v14 = vld [vmem:[#allocation5 + $0x18] sm:$0xf0]  ;;  %v2706_v37 = vld [vmem:[#allocation8 + $0xa0] sm:$0xf] }
  0x75   :  { %998 = vmatpush.bf16.msra.mxu0 %v2123_v49  ;;  %v2431_v48 = vor.u32 %v3213_v42, %v2428_v43  ;;  %v3145_v49 = vld [vmem:[#allocation5 + $0x4c] sm:$0xf]  ;;  %v2380_v19 = vld [vmem:[#allocation5 + $0x218] sm:$0xf0]  ;;  %v3286_v38 = vld [vmem:[#allocation8 + $0xac] sm:$0xf0] }
  0x76   :  { %1011 = vmatpush.bf16.msra.mxu1 %v2251_v54  ;;  %v2284_v54 = vld [vmem:[#allocation5 + $0x158] sm:$0xf0]  ;;  %v3233_v20 = vld [vmem:[#allocation5 + $0x30c] sm:$0xf]  ;;  %v2707_v42 = vor.u32 %v3286_v38, %v2706_v37  ;;  %v2690_v43 = vld [vmem:[#allocation8 + $0x80] sm:$0xf] }
  0x77   :  { %1024 = vmatpush.bf16.msra.mxu2 %v2379_v55  ;;  %v3209_v55 = vld [vmem:[#allocation5 + $0x24c] sm:$0xf]  ;;  %v2508_v21 = vld [vmem:[#allocation5 + $0x318] sm:$0xf0]  ;;  %v3358_v8 = vld [vmem:[#allocation8 + $0x2ec] sm:$0xf0] }
  0x78   :  { %1037 = vmatpush.bf16.msra.mxu3 %v2507_v58  ;;  %999 = vmatmul.bf16.vlgmr.msra.gmra.mxu0 %v3607_v59  ;;  %v2540_v58 = vld [vmem:[#allocation5 + $0x358] sm:$0xf0]  ;;  %v2511_v29 = vor.u32 %v3233_v20, %v2508_v21  ;;  %v2740_v9 = vld [vmem:[#allocation8 + $0xf0] sm:$0xf0]  ;;  %v3288_v20 = vld [vmem:[#allocation8 + $0xc4] sm:$0xf] }
  0x79   :  { %1043 = vmatpush.bf16.msrb.mxu0 %v2239_v61  ;;  %1012 = vmatmul.bf16.vlgmr.msra.gmra.mxu1 %v3611_v62  ;;  %v2159_v61 = vor.u32 %v3145_v49, %v2156_v50  ;;  %v3278_v49 = vld [vmem:[#allocation8 + $0x6c] sm:$0xf0]  ;;  %v2802_v50 = vld [vmem:[#allocation8 + $0x160] sm:$0xf]  ;;  %v2724_v21 = vld [vmem:[#allocation8 + $0xd0] sm:$0xf0] }
  0x7a   :  { %1056 = vmatpush.bf16.msrb.mxu1 %v2367_v63  ;;  %1025 = vmatmul.bf16.vlgmr.msra.gmra.mxu2 %v3605_v53  ;;  %v2287_v63 = vor.u32 %v3177_v51, %v2284_v54  ;;  %v2852_v25 = vld [vmem:[#allocation8 + $0x1d0] sm:$0xf0]  ;;  %v2727_v26 = vor.u32 %v3288_v20, %v2724_v21  ;;  %v2946_v37 = vld [vmem:[#allocation8 + $0x280] sm:$0xf]  ;;  %v3346_v38 = vld [vmem:[#allocation8 + $0x28c] sm:$0xf0] }
  0x7b   :  { %1069 = vmatpush.bf16.msrb.mxu2 %v2495_v0  ;;  %1038 = vmatmul.bf16.vlgmr.msra.gmra.mxu3 %v3609_v60  ;;  %v2415_v0 = vor.u32 %v3209_v55, %v2412_v56  ;;  %v2786_v55 = vld [vmem:[#allocation8 + $0x140] sm:$0xf]  ;;  %v3306_v56 = vld [vmem:[#allocation8 + $0x14c] sm:$0xf0]  ;;  %v3264_v20 = vld [vmem:[#allocation8 + $0x4] sm:$0xf] }
  0x7c   :  { %1082 = vmatpush.bf16.msrb.mxu3 %v2623_v4  ;;  %v2543_v4 = vor.u32 %v3241_v57, %v2540_v58  ;;  %v2642_v58 = vld [vmem:[#allocation8 + $0x20] sm:$0xf]  ;;  %v2628_v21 = vld [vmem:[#allocation8 + $0x10] sm:$0xf0] }
  0x7d   :  { %1044 = vmatpush.bf16.msrb.mxu0 %v2223_v10  ;;  %v2143_v10 = vor.u32 %v3141_v1, %v2140_v2  ;;  %v3302_v1 = vld [vmem:[#allocation8 + $0x12c] sm:$0xf0] }
  0x7e   :  { %1057 = vmatpush.bf16.msrb.mxu1 %v2351_v11  ;;  %v3137_v11 = vld [vmem:[#allocation5 + $0xc] sm:$0xf] }
  0x7f   :  { %1070 = vmatpush.bf16.msrb.mxu2 %v2479_v12  ;;  %v2271_v12 = vor.u32 %v3173_v3, %v2268_v5  ;;  %v2626_v3 = vld [vmem:[#allocation8] sm:$0xf]  ;;  %v3292_v5 = vld [vmem:[#allocation8 + $0xe4] sm:$0xf] }
  0x80   :  { %1083 = vmatpush.bf16.msrb.mxu3 %v2607_v16  ;;  %v2252_v16 = vld [vmem:[#allocation5 + $0x118] sm:$0xf0] }
  0x81   :  { %1045 = vmatpush.bf16.msrb.mxu0 %v2207_v22  ;;  %v2738_v22 = vld [vmem:[#allocation8 + $0xe0] sm:$0xf]  ;;  %v2255_v27 = vor.u32 %v3169_v15, %v2252_v16  ;;  %v2743_v16 = vor.u32 %v3292_v5, %v2740_v9  ;;  %v3334_v9 = vld [vmem:[#allocation8 + $0x22c] sm:$0xf0] }
  0x82   :  { %1058 = vmatpush.bf16.msrb.mxu1 %v2335_v23  ;;  %v3294_v23 = vld [vmem:[#allocation8 + $0xec] sm:$0xf0] }
  0x83   :  { %1071 = vmatpush.bf16.msrb.mxu2 %v2463_v24  ;;  %v2127_v24 = vor.u32 %v3137_v11, %v2124_v14  ;;  %v2739_v30 = vor.u32 %v3294_v23, %v2738_v22  ;;  %v3298_v11 = vld [vmem:[#allocation8 + $0x10c] sm:$0xf0]  ;;  %v2868_v14 = vld [vmem:[#allocation8 + $0x1f0] sm:$0xf0] }
  0x84   :  { %1084 = vmatpush.bf16.msrb.mxu3 %v2591_v28  ;;  %v2383_v28 = vor.u32 %v3201_v18, %v2380_v19  ;;  %v2978_v18 = vld [vmem:[#allocation8 + $0x2c0] sm:$0xf]  ;;  %v3354_v19 = vld [vmem:[#allocation8 + $0x2cc] sm:$0xf0] }
  0x85   :  { %1046 = vmatpush.bf16.msrb.mxu0 %v2191_v34  ;;  %v2850_v34 = vld [vmem:[#allocation8 + $0x1c0] sm:$0xf]  ;;  %v2979_v23 = vor.u32 %v3354_v19, %v2978_v18  ;;  %v2772_v18 = vld [vmem:[#allocation8 + $0x130] sm:$0xf0] }
  0x86   :  { %1059 = vmatpush.bf16.msrb.mxu1 %v2319_v35  ;;  %v3322_v35 = vld [vmem:[#allocation8 + $0x1cc] sm:$0xf0] }
  0x87   :  { %1072 = vmatpush.bf16.msrb.mxu2 %v2447_v36  ;;  %v2723_v36 = vor.u32 %v3290_v32, %v2722_v31  ;;  %v2851_v39 = vor.u32 %v3322_v35, %v2850_v34  ;;  %v2836_v34 = vld [vmem:[#allocation8 + $0x1b0] sm:$0xf0]  ;;  %v3629_v35 = vld [vmem:[#allocation7] sm:$0xf] }
  0x88   :  { %1085 = vmatpush.bf16.msrb.mxu3 %v2575_v40  ;;  %v2834_v40 = vld [vmem:[#allocation8 + $0x1a0] sm:$0xf] }
  0x89   :  { %1047 = vmatpush.bf16.msrb.mxu0 %v2175_v46  ;;  %v2835_v45 = vor.u32 %v3318_v41, %v2834_v40  ;;  %v2818_v46 = vld [vmem:[#allocation8 + $0x180] sm:$0xf]  ;;  %v2692_v40 = vld [vmem:[#allocation8 + $0x90] sm:$0xf0] }
  0x8a   :  { %1060 = vmatpush.bf16.msrb.mxu1 %v2303_v47  ;;  %v2691_v47 = vor.u32 %v3282_v44, %v2690_v43  ;;  %v225_v43 = vperm.slane %v3629_v35, 0  ;;  %v3312_v44 = vld [vmem:[#allocation8 + $0x184] sm:$0xf] }
  0x8b   :  { %1073 = vmatpush.bf16.msrb.mxu2 %v2431_v48  ;;  %v2674_v48 = vld [vmem:[#allocation8 + $0x60] sm:$0xf] }
  0x8c   :  { %1086 = vmatpush.bf16.msrb.mxu3 %v2559_v52  ;;  %v2675_v51 = vor.u32 %v3278_v49, %v2674_v48  ;;  %v2658_v52 = vld [vmem:[#allocation8 + $0x40] sm:$0xf]  ;;  %v3276_v49 = vld [vmem:[#allocation8 + $0x64] sm:$0xf] }
  0x8d   :  { %1048 = vmatpush.bf16.msrb.mxu0 %v2159_v61  ;;  %v3270_v61 = vld [vmem:[#allocation8 + $0x2c] sm:$0xf0] }
  0x8e   :  { %1061 = vmatpush.bf16.msrb.mxu1 %v2287_v63  ;;  %v2787_v63 = vor.u32 %v3306_v56, %v2786_v55  ;;  %v2643_v2 = vor.u32 %v3270_v61, %v2642_v58  ;;  %v3338_v58 = vld [vmem:[#allocation8 + $0x24c] sm:$0xf0]  ;;  %v3272_v61 = vld [vmem:[#allocation8 + $0x44] sm:$0xf] }
  0x8f   :  { %1074 = vmatpush.bf16.msrb.mxu2 %v2415_v0  ;;  %v2770_v0 = vld [vmem:[#allocation8 + $0x120] sm:$0xf] }
  0x90   :  { %1087 = vmatpush.bf16.msrb.mxu3 %v2543_v4  ;;  %v3266_v4 = vld [vmem:[#allocation8 + $0xc] sm:$0xf0]  ;;  %v2771_v6 = vor.u32 %v3302_v1, %v2770_v0 }
  0x91   :  { %1049 = vmatpush.bf16.msrb.mxu0 %v2143_v10  ;;  %v2754_v10 = vld [vmem:[#allocation8 + $0x100] sm:$0xf]  ;;  %v2627_v15 = vor.u32 %v3266_v4, %v2626_v3  ;;  %v3304_v3 = vld [vmem:[#allocation8 + $0x144] sm:$0xf]  ;;  %v2788_v4 = vld [vmem:[#allocation8 + $0x150] sm:$0xf0] }
  0x92   :  { %1062 = vmatpush.bf16.msrb.mxu1 %v2271_v12  ;;  %v2995_v12 = vor.u32 %v3358_v8, %v2994_v7  ;;  %v2898_v8 = vld [vmem:[#allocation8 + $0x220] sm:$0xf] }
  0x93   :  { %1075 = vmatpush.bf16.msrb.mxu2 %v2399_v13  ;;  %v3324_v13 = vld [vmem:[#allocation8 + $0x1e4] sm:$0xf] }
  0x94   :  { %1088 = vmatpush.bf16.msrb.mxu3 %v2527_v17  ;;  %v2755_v17 = vor.u32 %v3298_v11, %v2754_v10  ;;  %v2871_v22 = vor.u32 %v3324_v13, %v2868_v14  ;;  %v3268_v11 = vld [vmem:[#allocation8 + $0x24] sm:$0xf]  ;;  %v2791_v14 = vor.u32 %v3304_v3, %v2788_v4  ;;  %v2948_v4 = vld [vmem:[#allocation8 + $0x290] sm:$0xf0] }
  0x95   :  { %1050 = vmatpush.bf16.msrb.mxu0 %v2127_v24  ;;  %v3320_v24 = vld [vmem:[#allocation8 + $0x1c4] sm:$0xf] }
  0x96   :  { %1063 = vmatpush.bf16.msrb.mxu1 %v2255_v27  ;;  %v2962_v27 = vld [vmem:[#allocation8 + $0x2a0] sm:$0xf]  ;;  %v2855_v31 = vor.u32 %v3320_v24, %v2852_v25  ;;  %v3295_v24 = vld [vmem:[#allocation8 + $0xf4] sm:$0xf0] }
  0x97   :  { %1076 = vmatpush.bf16.msrb.mxu2 %v2383_v28  ;;  %v3350_v28 = vld [vmem:[#allocation8 + $0x2ac] sm:$0xf0]  ;;  %v2882_v25 = vld [vmem:[#allocation8 + $0x200] sm:$0xf] }
  0x98   :  { %1089 = vmatpush.bf16.msrb.mxu3 %v2511_v29  ;;  %1051 = vmatmul.bf16.vlgmr.msrb.gmra.mxu0 %v3607_v59  ;;  %v3314_v59 = vld [vmem:[#allocation8 + $0x18c] sm:$0xf0]  ;;  %v3284_v29 = vld [vmem:[#allocation8 + $0xa4] sm:$0xf]  ;;  %v2963_v32 = vor.u32 %v3350_v28, %v2962_v27 }
  0x99   :  { %1881 = vmatpush.bf16.msra.mxu0 %v2739_v30  ;;  %1064 = vmatmul.bf16.vlgmr.msrb.gmra.mxu1 %v3611_v62  ;;  %v2819_v62 = vor.u32 %v3314_v59, %v2818_v46  ;;  %v2708_v30 = vld [vmem:[#allocation8 + $0xb0] sm:$0xf0]  ;;  %v2930_v59 = vld [vmem:[#allocation8 + $0x260] sm:$0xf] }
  0x9a   :  { %1894 = vmatpush.bf16.msra.mxu1 %v2867_v33  ;;  %1077 = vmatmul.bf16.vlgmr.msrb.gmra.mxu2 %v3605_v53  ;;  %v3310_v53 = vld [vmem:[#allocation8 + $0x16c] sm:$0xf0]  ;;  %v3316_v33 = vld [vmem:[#allocation8 + $0x1a4] sm:$0xf] }
  0x9b   :  { %1090 = vmatmul.bf16.vlgmr.msrb.gmra.mxu3 %v3609_v60  ;;  %v3274_v60 = vld [vmem:[#allocation8 + $0x4c] sm:$0xf0]  ;;  %v2803_v54 = vor.u32 %v3310_v53, %v2802_v50  ;;  %1907 = vmatpush.bf16.msra.mxu2 %v2995_v12  ;;  %v2839_v41 = vor.u32 %v3316_v33, %v2836_v34  ;;  %v2644_v12 = vld [vmem:[#allocation8 + $0x30] sm:$0xf0] }
  0x9c   :  { %v2659_v57 = vor.u32 %v3274_v60, %v2658_v52  ;;  %v3308_v60 = vld [vmem:[#allocation8 + $0x164] sm:$0xf]  ;;  %v2756_v34 = vld [vmem:[#allocation8 + $0x110] sm:$0xf0] }
  0x9d   :  { %1882 = vmatpush.bf16.msra.mxu0 %v2723_v36  ;;  %v2711_v36 = vor.u32 %v3284_v29, %v2708_v30  ;;  %v3296_v30 = vld [vmem:[#allocation8 + $0x104] sm:$0xf] }
  0x9e   :  { %1895 = vmatpush.bf16.msra.mxu1 %v2851_v39  ;;  %v3280_v39 = vld [vmem:[#allocation8 + $0x84] sm:$0xf] }
  0x9f   :  { %1908 = vmatpush.bf16.msra.mxu2 %v2979_v23  ;;  %v2695_v46 = vor.u32 %v3280_v39, %v2692_v40  ;;  %v2746_v23 = vld [vmem:[#allocation8 + $0xe8] sm:$0xf] }
  0xa1   :  { %1883 = vmatpush.bf16.msra.mxu0 %v2707_v42  ;;  %v2947_v42 = vor.u32 %v3346_v38, %v2946_v37  ;;  %v3356_v37 = vld [vmem:[#allocation8 + $0x2e4] sm:$0xf]  ;;  %v2996_v38 = vld [vmem:[#allocation8 + $0x2f0] sm:$0xf0] }
  0xa2   :  { %1896 = vmatpush.bf16.msra.mxu1 %v2835_v45  ;;  %v2820_v45 = vld [vmem:[#allocation8 + $0x190] sm:$0xf0]  ;;  %v2999_v40 = vor.u32 %v3356_v37, %v2996_v38  ;;  %v3332_v37 = vld [vmem:[#allocation8 + $0x224] sm:$0xf]  ;;  %v2650_v38 = vld [vmem:[#allocation8 + $0x28] sm:$0xf] }
  0xa3   :  { %1909 = vmatpush.bf16.msra.mxu2 %v2963_v32  ;;  %v2823_v50 = vor.u32 %v3312_v44, %v2820_v45  ;;  %v3390_v32 = vld [vmem:[#allocation8 + $0x3ec] sm:$0xf0]  ;;  %v3106_v44 = vld [vmem:[#allocation8 + $0x3c0] sm:$0xf] }
  0xa4   :  { %v3386_v45 = vld [vmem:[#allocation8 + $0x3cc] sm:$0xf0] }
  0xa5   :  { %1884 = vmatpush.bf16.msra.mxu0 %v2691_v47  ;;  %v3342_v47 = vld [vmem:[#allocation8 + $0x26c] sm:$0xf0] }
  0xa6   :  { %1897 = vmatpush.bf16.msra.mxu1 %v2819_v62  ;;  %v2676_v62 = vld [vmem:[#allocation8 + $0x70] sm:$0xf0]  ;;  %v2931_v53 = vor.u32 %v3342_v47, %v2930_v59  ;;  %v2730_v59 = vld [vmem:[#allocation8 + $0xc8] sm:$0xf]  ;;  %v3291_v47 = vld [vmem:[#allocation8 + $0xd4] sm:$0xf0] }
  0xa7   :  { %1910 = vmatpush.bf16.msra.mxu2 %v2947_v42  ;;  %v2679_v55 = vor.u32 %v3276_v49, %v2676_v62  ;;  %v2747_v42 = vor.u32 %v3295_v24, %v2746_v23  ;;  %v2980_v49 = vld [vmem:[#allocation8 + $0x2d0] sm:$0xf0]  ;;  %v2666_v24 = vld [vmem:[#allocation8 + $0x48] sm:$0xf] }
  0xa9   :  { %1885 = vmatpush.bf16.msra.mxu0 %v2675_v51 }
  0xaa   :  { %1898 = vmatpush.bf16.msra.mxu1 %v2803_v54  ;;  %v2804_v54 = vld [vmem:[#allocation8 + $0x170] sm:$0xf0] }
  0xab   :  { %1911 = vmatpush.bf16.msra.mxu2 %v2931_v53  ;;  %v2807_v0 = vor.u32 %v3308_v60, %v2804_v54  ;;  %v3090_v53 = vld [vmem:[#allocation8 + $0x3a0] sm:$0xf]  ;;  %v2714_v60 = vld [vmem:[#allocation8 + $0xa8] sm:$0xf]  ;;  %v3287_v54 = vld [vmem:[#allocation8 + $0xb4] sm:$0xf0] }
  0xad   :  { %1886 = vmatpush.bf16.msra.mxu0 %v2659_v57  ;;  %v2914_v57 = vld [vmem:[#allocation8 + $0x240] sm:$0xf] }
  0xae   :  { %1899 = vmatpush.bf16.msra.mxu1 %v2787_v63  ;;  %v2660_v63 = vld [vmem:[#allocation8 + $0x50] sm:$0xf0]  ;;  %v2915_v1 = vor.u32 %v3338_v58, %v2914_v57  ;;  %v2715_v58 = vor.u32 %v3287_v54, %v2714_v60  ;;  %v2858_v54 = vld [vmem:[#allocation8 + $0x1c8] sm:$0xf] }
  0xaf   :  { %v2663_v7 = vor.u32 %v3272_v61, %v2660_v63  ;;  %v3074_v61 = vld [vmem:[#allocation8 + $0x380] sm:$0xf]  ;;  %v3378_v63 = vld [vmem:[#allocation8 + $0x38c] sm:$0xf0] }
  0xb0   :  { %1912 = vmatpush.bf16.msra.mxu2 %v2915_v1  ;;  %v2698_v1 = vld [vmem:[#allocation8 + $0x88] sm:$0xf]  ;;  %v3075_v3 = vor.u32 %v3378_v63, %v3074_v61  ;;  %v3323_v61 = vld [vmem:[#allocation8 + $0x1d4] sm:$0xf0] }
  0xb1   :  { %1887 = vmatpush.bf16.msra.mxu0 %v2643_v2 }
  0xb2   :  { %1900 = vmatpush.bf16.msra.mxu1 %v2771_v6 }
  0xb5   :  { %1888 = vmatpush.bf16.msra.mxu0 %v2627_v15  ;;  %v2899_v15 = vor.u32 %v3334_v9, %v2898_v8  ;;  %v3058_v8 = vld [vmem:[#allocation8 + $0x360] sm:$0xf]  ;;  %v3374_v9 = vld [vmem:[#allocation8 + $0x36c] sm:$0xf0] }
  0xb6   :  { %1901 = vmatpush.bf16.msra.mxu1 %v2755_v17  ;;  %v3300_v17 = vld [vmem:[#allocation8 + $0x124] sm:$0xf] }
  0xb7   :  { %1913 = vmatpush.bf16.msra.mxu2 %v2899_v15  ;;  %v2775_v28 = vor.u32 %v3300_v17, %v2772_v18 }
  0xb8   :  { %v896_v48 = vpop.f32.mrf.mxu0 }
  0xb9   :  { %1933 = vmatpush.bf16.msrb.mxu0 %v2743_v16  ;;  %v897_v51 = vadd.f32 %v896_v48, %v225_v43  ;;  %v909_v52 = vpop.f32.mrf.mxu1  ;;  %v2759_v43 = vor.u32 %v3296_v30, %v2756_v34  ;;  %v3107_v48 = vor.u32 %v3386_v45, %v3106_v44  ;;  %v3026_v34 = vld [vmem:[#allocation8 + $0x320] sm:$0xf]  ;;  %v3327_v44 = vld [vmem:[#allocation8 + $0x1f4] sm:$0xf0] }
  0xba   :  { %1946 = vmatpush.bf16.msrb.mxu1 %v2871_v22  ;;  %v2647_v22 = vor.u32 %v3268_v11, %v2644_v12  ;;  %v2682_v11 = vld [vmem:[#allocation8 + $0x68] sm:$0xf]  ;;  %v3279_v12 = vld [vmem:[#allocation8 + $0x74] sm:$0xf0] }
  0xbb   :  { %v910_v56 = vadd.f32 %v909_v52, %v897_v51  ;;  %v3382_v51 = vld [vmem:[#allocation8 + $0x3ac] sm:$0xf0]  ;;  %v3348_v52 = vld [vmem:[#allocation8 + $0x2a4] sm:$0xf] }
  0xbd   :  { %1934 = vmatpush.bf16.msrb.mxu0 %v2727_v26  ;;  %v922_v2 = vpop.f32.mrf.mxu2  ;;  %v3330_v26 = vld [vmem:[#allocation8 + $0x20c] sm:$0xf0] }
  0xbe   :  { %1947 = vmatpush.bf16.msrb.mxu1 %v2855_v31  ;;  %v923_v5 = vadd.f32 %v922_v2, %v910_v56  ;;  %v2883_v29 = vor.u32 %v3330_v26, %v2882_v25  ;;  %v3122_v31 = vld [vmem:[#allocation8 + $0x3e0] sm:$0xf]  ;;  %v2964_v56 = vld [vmem:[#allocation8 + $0x2b0] sm:$0xf0]  ;;  %v3283_v2 = vld [vmem:[#allocation8 + $0x94] sm:$0xf0] }
  0xbf   :  { %v2967_v57 = vor.u32 %v3348_v52, %v2964_v56  ;;  %v3275_v25 = vld [vmem:[#allocation8 + $0x54] sm:$0xf0]  ;;  %v3362_v52 = vld [vmem:[#allocation8 + $0x30c] sm:$0xf0]  ;;  %v3328_v56 = vld [vmem:[#allocation8 + $0x204] sm:$0xf] }
  0xc0   :  { %v935_v6 = vpop.f32.mrf.mxu3  ;;  %v898_v13 = vpop.f32.mrf.mxu0  ;;  %1914 = vmatpush.bf16.msra.mxu2 %v2883_v29 }
  0xc1   :  { %1935 = vmatpush.bf16.msrb.mxu0 %v2711_v36  ;;  %v936_v10 = vadd.f32 %v935_v6, %v923_v5  ;;  %v911_v16 = vpop.f32.mrf.mxu1  ;;  %v3123_v36 = vor.u32 %v3390_v32, %v3122_v31  ;;  %v226_v6 = vperm.slane %v3629_v35, 1  ;;  %v3059_v13 = vor.u32 %v3374_v9, %v3058_v8  ;;  %v3289_v8 = vld [vmem:[#allocation8 + $0xcc] sm:$0xf]  ;;  %v3384_v9 = vld [vmem:[#allocation8 + $0x3c4] sm:$0xf] }
  0xc2   :  { %1948 = vmatpush.bf16.msrb.mxu1 %v2839_v41  ;;  %v2631_v41 = vor.u32 %v3264_v20, %v2628_v21  ;;  %v3042_v20 = vld [vmem:[#allocation8 + $0x340] sm:$0xf]  ;;  %v3370_v21 = vld [vmem:[#allocation8 + $0x34c] sm:$0xf0] }
  0xc3   :  { %v1095_v19 = vmax.f32 %v936_v10, 0.0  ;;  %1920 = vmatpush.bf16.msra.mxu3 %v3123_v36  ;;  %v3340_v10 = vld [vmem:[#allocation8 + $0x264] sm:$0xf]  ;;  %v3043_v26 = vor.u32 %v3370_v21, %v3042_v20  ;;  %v3366_v36 = vld [vmem:[#allocation8 + $0x32c] sm:$0xf0] }
  0xc4   :  { %1959 = vmatpush.bf16.msrb.mxu2 %v2999_v40  ;;  %v3027_v40 = vor.u32 %v3366_v36, %v3026_v34  ;;  %v2716_v20 = vld [vmem:[#allocation8 + $0xb8] sm:$0xf0]  ;;  %v2826_v21 = vld [vmem:[#allocation8 + $0x188] sm:$0xf]  ;;  %v227_v34 = vperm.slane %v3629_v35, 2 }
  0xc5   :  { %1936 = vmatpush.bf16.msrb.mxu0 %v2695_v46  ;;  %v3632_v27 = vpack.c.bf16 %v1095_v19, %v1095_v19  ;;  %v924_v33 = vpop.f32.mrf.mxu2  ;;  %v3352_v46 = vld [vmem:[#allocation8 + $0x2c4] sm:$0xf]  ;;  %v2683_v19 = vor.u32 %v3279_v12, %v2682_v11  ;;  %v2732_v11 = vld [vmem:[#allocation8 + $0xd8] sm:$0xf0]  ;;  %v2842_v12 = vld [vmem:[#allocation8 + $0x1a8] sm:$0xf] }
  0xc6   :  { %1949 = vmatpush.bf16.msrb.mxu1 %v2823_v50  ;;  %v2983_v62 = vor.u32 %v3352_v46, %v2980_v49  ;;  %v2731_v50 = vor.u32 %v3291_v47, %v2730_v59  ;;  %v2667_v33 = vor.u32 %v3275_v25, %v2666_v24  ;;  %v2634_v59 = vld [vmem:[#allocation8 + $0x8] sm:$0xf]  ;;  %v3267_v47 = vld [vmem:[#allocation8 + $0x14] sm:$0xf0]  ;;  %v3376_v24 = vld [vmem:[#allocation8 + $0x384] sm:$0xf] }
  0xc7   :  { %1889 = vmatmul.bf16.vlgmr.msra.gmra.mxu0 %v3632_v27  ;;  %1921 = vmatpush.bf16.msra.mxu3 %v3107_v48  ;;  %v3076_v25 = vld [vmem:[#allocation8 + $0x390] sm:$0xf0] }
  0xc8   :  { %v937_v39 = vpop.f32.mrf.mxu3  ;;  %1960 = vmatpush.bf16.msrb.mxu2 %v2983_v62 }
  0xc9   :  { %1937 = vmatpush.bf16.msrb.mxu0 %v2679_v55  ;;  %v3091_v55 = vor.u32 %v3382_v51, %v3090_v53  ;;  %v3271_v39 = vld [vmem:[#allocation8 + $0x34] sm:$0xf0]  ;;  %v2748_v53 = vld [vmem:[#allocation8 + $0xf8] sm:$0xf0]  ;;  %v3010_v51 = vld [vmem:[#allocation8 + $0x300] sm:$0xf] }
  0xca   :  { %1950 = vmatpush.bf16.msrb.mxu1 %v2807_v0  ;;  %v3344_v0 = vld [vmem:[#allocation8 + $0x284] sm:$0xf]  ;;  %v2651_v62 = vor.u32 %v3271_v39, %v2650_v38  ;;  %v3277_v38 = vld [vmem:[#allocation8 + $0x6c] sm:$0xf] }
  0xcb   :  { %1922 = vmatpush.bf16.msra.mxu3 %v3091_v55  ;;  %v2951_v5 = vor.u32 %v3344_v0, %v2948_v4  ;;  %v3011_v55 = vor.u32 %v3362_v52, %v3010_v51  ;;  %v3388_v0 = vld [vmem:[#allocation8 + $0x3e4] sm:$0xf]  ;;  %v2635_v4 = vor.u32 %v3267_v47, %v2634_v59  ;;  %v2778_v51 = vld [vmem:[#allocation8 + $0x128] sm:$0xf]  ;;  %v3303_v52 = vld [vmem:[#allocation8 + $0x134] sm:$0xf0] }
  0xcc   :  { %1961 = vmatpush.bf16.msrb.mxu2 %v2967_v57  ;;  %v2884_v57 = vld [vmem:[#allocation8 + $0x210] sm:$0xf0]  ;;  %v3372_v39 = vld [vmem:[#allocation8 + $0x364] sm:$0xf] }
  0xcd   :  { %1938 = vmatpush.bf16.msrb.mxu0 %v2663_v7  ;;  %v2699_v7 = vor.u32 %v3283_v2, %v2698_v1  ;;  %v2887_v63 = vor.u32 %v3328_v56, %v2884_v57  ;;  %v3124_v1 = vld [vmem:[#allocation8 + $0x3f0] sm:$0xf0]  ;;  %v2779_v57 = vor.u32 %v3303_v52, %v2778_v51  ;;  %v3305_v52 = vld [vmem:[#allocation8 + $0x14c] sm:$0xf] }
  0xce   :  { %1951 = vmatpush.bf16.msrb.mxu1 %v2791_v14  ;;  %v2932_v14 = vld [vmem:[#allocation8 + $0x270] sm:$0xf0] }
  0xcf   :  { %1923 = vmatpush.bf16.msra.mxu3 %v3075_v3  ;;  %v2935_v16 = vor.u32 %v3340_v10, %v2932_v14  ;;  %v3127_v3 = vor.u32 %v3388_v0, %v3124_v1  ;;  %v3108_v10 = vld [vmem:[#allocation8 + $0x3d0] sm:$0xf0] }
  0xd0   :  { %1962 = vmatpush.bf16.msrb.mxu2 %v2951_v5  ;;  %v3111_v14 = vor.u32 %v3384_v9, %v3108_v10  ;;  %v3028_v0 = vld [vmem:[#allocation8 + $0x330] sm:$0xf0] }
  0xd1   :  { %1939 = vmatpush.bf16.msrb.mxu0 %v2647_v22  ;;  %v3336_v22 = vld [vmem:[#allocation8 + $0x244] sm:$0xf] }
  0xd2   :  { %1952 = vmatpush.bf16.msrb.mxu1 %v2775_v28  ;;  %v2916_v28 = vld [vmem:[#allocation8 + $0x250] sm:$0xf0] }
  0xd3   :  { %1924 = vmatpush.bf16.msra.mxu3 %v3059_v13  ;;  %v2919_v29 = vor.u32 %v3336_v22, %v2916_v28  ;;  %v3319_v13 = vld [vmem:[#allocation8 + $0x1b4] sm:$0xf0] }
  0xd4   :  { %1963 = vmatpush.bf16.msrb.mxu2 %v2935_v16  ;;  %v3092_v16 = vld [vmem:[#allocation8 + $0x3b0] sm:$0xf0]  ;;  %v3315_v22 = vld [vmem:[#allocation8 + $0x194] sm:$0xf0] }
  0xd5   :  { %1940 = vmatpush.bf16.msrb.mxu0 %v2631_v41  ;;  %v948_v15 = vpop.f32.mrf.mxu0  ;;  %v2900_v41 = vld [vmem:[#allocation8 + $0x230] sm:$0xf0]  ;;  %v2827_v28 = vor.u32 %v3315_v22, %v2826_v21  ;;  %v2636_v21 = vld [vmem:[#allocation8 + $0x18] sm:$0xf0] }
  0xd6   :  { %1953 = vmatpush.bf16.msrb.mxu1 %v2759_v43  ;;  %v949_v17 = vadd.f32 %v948_v15, %v226_v6  ;;  %v961_v18 = vpop.f32.mrf.mxu1  ;;  %v2874_v43 = vld [vmem:[#allocation8 + $0x1e8] sm:$0xf]  ;;  %v2903_v46 = vor.u32 %v3332_v37, %v2900_v41  ;;  %v3380_v15 = vld [vmem:[#allocation8 + $0x3a4] sm:$0xf]  ;;  %v2684_v41 = vld [vmem:[#allocation8 + $0x78] sm:$0xf0] }
  0xd7   :  { %1925 = vmatpush.bf16.msra.mxu3 %v3043_v26  ;;  %v2875_v60 = vor.u32 %v3327_v44, %v2874_v43  ;;  %v3307_v43 = vld [vmem:[#allocation8 + $0x154] sm:$0xf0]  ;;  %v2687_v47 = vor.u32 %v3277_v38, %v2684_v41  ;;  %v2970_v38 = vld [vmem:[#allocation8 + $0x2a8] sm:$0xf] }
  0xd8   :  { %1941 = vmatmul.bf16.vlgmr.msrb.gmra.mxu0 %v3632_v27  ;;  %v962_v23 = vadd.f32 %v961_v18, %v949_v17  ;;  %1964 = vmatpush.bf16.msrb.mxu2 %v2919_v29  ;;  %v2735_v17 = vor.u32 %v3289_v8, %v2732_v11  ;;  %v2843_v18 = vor.u32 %v3319_v13, %v2842_v12  ;;  %v3281_v29 = vld [vmem:[#allocation8 + $0x8c] sm:$0xf]  ;;  %v2876_v8 = vld [vmem:[#allocation8 + $0x1f8] sm:$0xf0]  ;;  %v3002_v11 = vld [vmem:[#allocation8 + $0x2e8] sm:$0xf] }
  0xd9   :  { %1985 = vmatpush.bf16.msra.mxu0 %v2747_v42  ;;  %v3359_v12 = vld [vmem:[#allocation8 + $0x2f4] sm:$0xf0] }
  0xda   :  { %v3003_v22 = vor.u32 %v3359_v12, %v3002_v11  ;;  %v2890_v12 = vld [vmem:[#allocation8 + $0x208] sm:$0xf] }
  0xdb   :  { %1926 = vmatpush.bf16.msra.mxu3 %v3027_v40  ;;  %v3060_v40 = vld [vmem:[#allocation8 + $0x370] sm:$0xf0] }
  0xdc   :  { %1965 = vmatpush.bf16.msrb.mxu2 %v2903_v46  ;;  %v3063_v44 = vor.u32 %v3372_v39, %v3060_v40  ;;  %v3351_v39 = vld [vmem:[#allocation8 + $0x2b4] sm:$0xf0] }
  0xdd   :  { %1986 = vmatpush.bf16.msra.mxu0 %v2731_v50  ;;  %v974_v30 = vpop.f32.mrf.mxu2  ;;  %v950_v45 = vpop.f32.mrf.mxu0  ;;  %v3293_v50 = vld [vmem:[#allocation8 + $0xec] sm:$0xf]  ;;  %v2971_v41 = vor.u32 %v3351_v39, %v2970_v38  ;;  %v2972_v38 = vld [vmem:[#allocation8 + $0x2b8] sm:$0xf0]  ;;  %v3098_v39 = vld [vmem:[#allocation8 + $0x3a8] sm:$0xf] }
  0xde   :  { %v975_v31 = vadd.f32 %v974_v30, %v962_v23  ;;  %v987_v32 = vpop.f32.mrf.mxu3  ;;  %v963_v48 = vpop.f32.mrf.mxu1  ;;  %v2751_v6 = vor.u32 %v3293_v50, %v2748_v53  ;;  %v3095_v23 = vor.u32 %v3380_v15, %v3092_v16  ;;  %v2700_v30 = vld [vmem:[#allocation8 + $0x98] sm:$0xf0]  ;;  %v3044_v50 = vld [vmem:[#allocation8 + $0x350] sm:$0xf0]  ;;  %v3360_v16 = vld [vmem:[#allocation8 + $0x304] sm:$0xf] }
  0xdf   :  { %1927 = vmatpush.bf16.msra.mxu3 %v3011_v55  ;;  %v2703_v36 = vor.u32 %v3281_v29, %v2700_v30  ;;  %v2668_v53 = vld [vmem:[#allocation8 + $0x58] sm:$0xf0]  ;;  %v3355_v29 = vld [vmem:[#allocation8 + $0x2d4] sm:$0xf0] }
  0xe0   :  { %v988_v42 = vadd.f32 %v987_v32, %v975_v31  ;;  %1966 = vmatpush.bf16.msrb.mxu2 %v2887_v63  ;;  %v2810_v31 = vld [vmem:[#allocation8 + $0x168] sm:$0xf]  ;;  %v3311_v32 = vld [vmem:[#allocation8 + $0x174] sm:$0xf0]  ;;  %v3364_v63 = vld [vmem:[#allocation8 + $0x324] sm:$0xf] }
  0xe1   :  { %1987 = vmatpush.bf16.msra.mxu0 %v2715_v58  ;;  %v2811_v37 = vor.u32 %v3311_v32, %v2810_v31 }
  0xe2   :  { %v1096_v49 = vmax.f32 %v988_v42, 0.0  ;;  %v2794_v42 = vld [vmem:[#allocation8 + $0x148] sm:$0xf] }
  0xe3   :  { %1972 = vmatpush.bf16.msrb.mxu3 %v3127_v3  ;;  %v2795_v48 = vor.u32 %v3307_v43, %v2794_v42  ;;  %v2652_v3 = vld [vmem:[#allocation8 + $0x38] sm:$0xf0]  ;;  %v3313_v42 = vld [vmem:[#allocation8 + $0x18c] sm:$0xf] }
  0xe4   :  { %v3637_v58 = vpack.c.bf16 %v1096_v49, %v1096_v49  ;;  %v3273_v49 = vld [vmem:[#allocation8 + $0x4c] sm:$0xf]  ;;  %v2828_v43 = vld [vmem:[#allocation8 + $0x198] sm:$0xf0] }
  0xe5   :  { %1988 = vmatpush.bf16.msra.mxu0 %v2699_v7  ;;  %v976_v2 = vpop.f32.mrf.mxu2  ;;  %v2859_v7 = vor.u32 %v3323_v61, %v2858_v54  ;;  %v2671_v56 = vor.u32 %v3273_v49, %v2668_v53  ;;  %v3269_v61 = vld [vmem:[#allocation8 + $0x2c] sm:$0xf]  ;;  %v2938_v49 = vld [vmem:[#allocation8 + $0x268] sm:$0xf] }
  0xe6   :  { %1902 = vmatmul.bf16.vlgmr.msra.gmra.mxu1 %v3637_v58  ;;  %v989_v5 = vpop.f32.mrf.mxu3  ;;  %v2655_v13 = vor.u32 %v3269_v61, %v2652_v3  ;;  %v3335_v3 = vld [vmem:[#allocation8 + $0x234] sm:$0xf0] }
  0xe7   :  { %1998 = vmatpush.bf16.msra.mxu1 %v2875_v60  ;;  %1973 = vmatpush.bf16.msrb.mxu3 %v3111_v14  ;;  %v3299_v5 = vld [vmem:[#allocation8 + $0x114] sm:$0xf0] }
  0xe9   :  { %1989 = vmatpush.bf16.msra.mxu0 %v2683_v19  ;;  %v3285_v19 = vld [vmem:[#allocation8 + $0xac] sm:$0xf] }
  0xea   :  { %v2719_v26 = vor.u32 %v3285_v19, %v2716_v20  ;;  %v3265_v20 = vld [vmem:[#allocation8 + $0xc] sm:$0xf] }
  0xeb   :  { %1999 = vmatpush.bf16.msra.mxu1 %v2859_v7  ;;  %1974 = vmatpush.bf16.msrb.mxu3 %v3095_v23  ;;  %v3325_v7 = vld [vmem:[#allocation8 + $0x1ec] sm:$0xf]  ;;  %v2639_v30 = vor.u32 %v3265_v20, %v2636_v21  ;;  %v3391_v20 = vld [vmem:[#allocation8 + $0x3f4] sm:$0xf0] }
  0xec   :  { %v2879_v19 = vor.u32 %v3325_v7, %v2876_v8  ;;  %v3321_v23 = vld [vmem:[#allocation8 + $0x1cc] sm:$0xf]  ;;  %v2764_v8 = vld [vmem:[#allocation8 + $0x118] sm:$0xf0] }
  0xed   :  { %1990 = vmatpush.bf16.msra.mxu0 %v2667_v33  ;;  %v3079_v33 = vor.u32 %v3376_v24, %v3076_v25  ;;  %v2860_v24 = vld [vmem:[#allocation8 + $0x1d8] sm:$0xf0]  ;;  %v3297_v7 = vld [vmem:[#allocation8 + $0x10c] sm:$0xf] }
  0xee   :  { %v2863_v32 = vor.u32 %v3321_v23, %v2860_v24 }
  0xef   :  { %2000 = vmatpush.bf16.msra.mxu1 %v2843_v18  ;;  %1975 = vmatpush.bf16.msrb.mxu3 %v3079_v33 }
  0xf1   :  { %1991 = vmatpush.bf16.msra.mxu0 %v2651_v62  ;;  %v3368_v62 = vld [vmem:[#allocation8 + $0x344] sm:$0xf] }
  0xf2   :  { %v3047_v60 = vor.u32 %v3368_v62, %v3044_v50  ;;  %v3343_v62 = vld [vmem:[#allocation8 + $0x274] sm:$0xf0]  ;;  %v228_v50 = vperm.slane %v3629_v35, 3 }
  0xf3   :  { %2001 = vmatpush.bf16.msra.mxu1 %v2827_v28  ;;  %1976 = vmatpush.bf16.msrb.mxu3 %v3063_v44  ;;  %v2986_v28 = vld [vmem:[#allocation8 + $0x2c8] sm:$0xf]  ;;  %v2939_v51 = vor.u32 %v3343_v62, %v2938_v49  ;;  %v3375_v62 = vld [vmem:[#allocation8 + $0x374] sm:$0xf0] }
  0xf4   :  { %v2954_v44 = vld [vmem:[#allocation8 + $0x288] sm:$0xf] }
  0xf5   :  { %1992 = vmatpush.bf16.msra.mxu0 %v2635_v4  ;;  %v1000_v45 = vpop.f32.mrf.mxu0  ;;  %v2762_v4 = vld [vmem:[#allocation8 + $0x108] sm:$0xf] }
  0xf6   :  { %1954 = vmatmul.bf16.vlgmr.msrb.gmra.mxu1 %v3637_v58  ;;  %v1001_v46 = vadd.f32 %v1000_v45, %v227_v34  ;;  %v1013_v59 = vpop.f32.mrf.mxu1  ;;  %v2763_v14 = vor.u32 %v3299_v5, %v2762_v4  ;;  %v2987_v34 = vor.u32 %v3355_v29, %v2986_v28  ;;  %v3347_v45 = vld [vmem:[#allocation8 + $0x294] sm:$0xf0]  ;;  %v2988_v28 = vld [vmem:[#allocation8 + $0x2d8] sm:$0xf0]  ;;  %v3066_v49 = vld [vmem:[#allocation8 + $0x368] sm:$0xf] }
  0xf7   :  { %2002 = vmatpush.bf16.msra.mxu1 %v2811_v37  ;;  %1977 = vmatpush.bf16.msrb.mxu3 %v3047_v60  ;;  %v2844_v37 = vld [vmem:[#allocation8 + $0x1b8] sm:$0xf0] }
  0xf8   :  { %1993 = vmatmul.bf16.vlgmr.msra.gmra.mxu0 %v3632_v27  ;;  %v1014_v54 = vadd.f32 %v1013_v59, %v1001_v46  ;;  %v2831_v46 = vor.u32 %v3313_v42, %v2828_v43  ;;  %v2955_v59 = vor.u32 %v3347_v45, %v2954_v44  ;;  %v2796_v60 = vld [vmem:[#allocation8 + $0x158] sm:$0xf0]  ;;  %v3345_v43 = vld [vmem:[#allocation8 + $0x28c] sm:$0xf]  ;;  %v3082_v45 = vld [vmem:[#allocation8 + $0x388] sm:$0xf] }
  0xf9   :  { %2037 = vmatpush.bf16.msrb.mxu0 %v2751_v6  ;;  %v3031_v6 = vor.u32 %v3364_v63, %v3028_v0  ;;  %v2799_v61 = vor.u32 %v3305_v52, %v2796_v60  ;;  %v3301_v0 = vld [vmem:[#allocation8 + $0x12c] sm:$0xf]  ;;  %v2956_v44 = vld [vmem:[#allocation8 + $0x298] sm:$0xf0]  ;;  %v3050_v60 = vld [vmem:[#allocation8 + $0x348] sm:$0xf] }
  0xfa   :  { %v2924_v52 = vld [vmem:[#allocation8 + $0x258] sm:$0xf0] }
  0xfb   :  { %2003 = vmatpush.bf16.msra.mxu1 %v2795_v48  ;;  %1978 = vmatpush.bf16.msrb.mxu3 %v3031_v6  ;;  %v2812_v48 = vld [vmem:[#allocation8 + $0x178] sm:$0xf0] }
  0xfd   :  { %2038 = vmatpush.bf16.msrb.mxu0 %v2735_v17  ;;  %v1026_v55 = vpop.f32.mrf.mxu2  ;;  %v1002_v10 = vpop.f32.mrf.mxu0  ;;  %v3012_v17 = vld [vmem:[#allocation8 + $0x310] sm:$0xf0] }
  0xfe   :  { %v1027_v1 = vadd.f32 %v1026_v55, %v1014_v54  ;;  %v1039_v2 = vpop.f32.mrf.mxu3  ;;  %v1015_v15 = vpop.f32.mrf.mxu1  ;;  %v3015_v25 = vor.u32 %v3360_v16, %v3012_v17  ;;  %v3339_v55 = vld [vmem:[#allocation8 + $0x254] sm:$0xf0]  ;;  %v3004_v16 = vld [vmem:[#allocation8 + $0x2f8] sm:$0xf0] }
  0xff   :  { %2004 = vmatpush.bf16.msra.mxu1 %v2779_v57  ;;  %v3357_v15 = vld [vmem:[#allocation8 + $0x2ec] sm:$0xf] }
 0x100   :  { %v1040_v9 = vadd.f32 %v1039_v2, %v1027_v1  ;;  %1979 = vmatpush.bf16.msrb.mxu3 %v3015_v25  ;;  %v2780_v1 = vld [vmem:[#allocation8 + $0x138] sm:$0xf0]  ;;  %v2906_v2 = vld [vmem:[#allocation8 + $0x228] sm:$0xf]  ;;  %v3007_v23 = vor.u32 %v3357_v15, %v3004_v16  ;;  %v3353_v25 = vld [vmem:[#allocation8 + $0x2cc] sm:$0xf] }
 0x101   :  { %2039 = vmatpush.bf16.msrb.mxu0 %v2719_v26  ;;  %v2783_v4 = vor.u32 %v3301_v0, %v2780_v1  ;;  %v2907_v6 = vor.u32 %v3335_v3, %v2906_v2  ;;  %v2892_v2 = vld [vmem:[#allocation8 + $0x218] sm:$0xf0]  ;;  %v3018_v3 = vld [vmem:[#allocation8 + $0x308] sm:$0xf] }
 0x102   :  { %v1097_v18 = vmax.f32 %v1040_v9, 0.0 }
 0x103   :  { %2005 = vmatpush.bf16.msra.mxu1 %v2763_v14 }
 0x104   :  { %v3643_v26 = vpack.c.bf16 %v1097_v18, %v1097_v18  ;;  %v2767_v18 = vor.u32 %v3297_v7, %v2764_v8 }
 0x105   :  { %2040 = vmatpush.bf16.msrb.mxu0 %v2703_v36  ;;  %v1028_v31 = vpop.f32.mrf.mxu2  ;;  %v3317_v36 = vld [vmem:[#allocation8 + $0x1ac] sm:$0xf] }
 0x106   :  { %1915 = vmatmul.bf16.vlgmr.msra.gmra.mxu2 %v3643_v26  ;;  %v1041_v33 = vpop.f32.mrf.mxu3  ;;  %2006 = vmatmul.bf16.vlgmr.msra.gmra.mxu1 %v3637_v58  ;;  %v2847_v40 = vor.u32 %v3317_v36, %v2844_v37  ;;  %v3387_v31 = vld [vmem:[#allocation8 + $0x3d4] sm:$0xf0]  ;;  %v3349_v37 = vld [vmem:[#allocation8 + $0x2ac] sm:$0xf] }
 0x107   :  { %2050 = vmatpush.bf16.msrb.mxu1 %v2879_v19  ;;  %2011 = vmatpush.bf16.msra.mxu2 %v3003_v22  ;;  %v3130_v19 = vld [vmem:[#allocation8 + $0x3e8] sm:$0xf] }
 0x108   :  { %v3131_v24 = vor.u32 %v3391_v20, %v3130_v19  ;;  %v3373_v20 = vld [vmem:[#allocation8 + $0x36c] sm:$0xf] }
 0x109   :  { %2041 = vmatpush.bf16.msrb.mxu0 %v2687_v47  ;;  %v3309_v47 = vld [vmem:[#allocation8 + $0x16c] sm:$0xf] }
 0x10a   :  { %v2815_v53 = vor.u32 %v3309_v47, %v2812_v48  ;;  %v2940_v48 = vld [vmem:[#allocation8 + $0x278] sm:$0xf0] }
 0x10b   :  { %2051 = vmatpush.bf16.msrb.mxu1 %v2863_v32  ;;  %2012 = vmatpush.bf16.msra.mxu2 %v2987_v34  ;;  %v2991_v34 = vor.u32 %v3353_v25, %v2988_v28  ;;  %v3052_v25 = vld [vmem:[#allocation8 + $0x358] sm:$0xf0]  ;;  %v3365_v28 = vld [vmem:[#allocation8 + $0x32c] sm:$0xf] }
 0x10d   :  { %2042 = vmatpush.bf16.msrb.mxu0 %v2671_v56 }
 0x10f   :  { %2052 = vmatpush.bf16.msrb.mxu1 %v2847_v40  ;;  %2013 = vmatpush.bf16.msra.mxu2 %v2971_v41  ;;  %v3383_v40 = vld [vmem:[#allocation8 + $0x3b4] sm:$0xf0]  ;;  %v2975_v41 = vor.u32 %v3349_v37, %v2972_v38 }
 0x110   :  { %v3099_v42 = vor.u32 %v3383_v40, %v3098_v39 }
 0x111   :  { %2043 = vmatpush.bf16.msrb.mxu0 %v2655_v13  ;;  %v3331_v13 = vld [vmem:[#allocation8 + $0x214] sm:$0xf0] }
 0x112   :  { %v2891_v21 = vor.u32 %v3331_v13, %v2890_v12  ;;  %v3381_v13 = vld [vmem:[#allocation8 + $0x3ac] sm:$0xf] }
 0x113   :  { %2053 = vmatpush.bf16.msrb.mxu1 %v2831_v46  ;;  %2014 = vmatpush.bf16.msra.mxu2 %v2955_v59  ;;  %v3379_v46 = vld [vmem:[#allocation8 + $0x394] sm:$0xf0]  ;;  %v2959_v59 = vor.u32 %v3345_v43, %v2956_v44 }
 0x114   :  { %v3083_v47 = vor.u32 %v3379_v46, %v3082_v45 }
 0x115   :  { %2044 = vmatpush.bf16.msrb.mxu0 %v2639_v30  ;;  %v1052_v54 = vpop.f32.mrf.mxu0  ;;  %v3114_v30 = vld [vmem:[#allocation8 + $0x3c8] sm:$0xf] }
 0x116   :  { %v1053_v56 = vadd.f32 %v1052_v54, %v228_v50  ;;  %v1065_v57 = vpop.f32.mrf.mxu1  ;;  %1967 = vmatmul.bf16.vlgmr.msrb.gmra.mxu2 %v3643_v26  ;;  %v3115_v36 = vor.u32 %v3387_v31, %v3114_v30  ;;  %v3371_v54 = vld [vmem:[#allocation8 + $0x354] sm:$0xf0]  ;;  %v3036_v30 = vld [vmem:[#allocation8 + $0x338] sm:$0xf0] }
 0x117   :  { %2054 = vmatpush.bf16.msrb.mxu1 %v2815_v53  ;;  %2015 = vmatpush.bf16.msra.mxu2 %v2939_v51  ;;  %v3067_v53 = vor.u32 %v3375_v62, %v3066_v49  ;;  %v3337_v51 = vld [vmem:[#allocation8 + $0x24c] sm:$0xf]  ;;  %v3039_v31 = vor.u32 %v3365_v28, %v3036_v30 }
 0x118   :  { %2045 = vmatmul.bf16.vlgmr.msrb.gmra.mxu0 %v3632_v27  ;;  %v2922_v27 = vld [vmem:[#allocation8 + $0x248] sm:$0xf]  ;;  %v1066_v35 = vadd.f32 %v1065_v57, %v1053_v56  ;;  %v3333_v56 = vld [vmem:[#allocation8 + $0x22c] sm:$0xf]  ;;  %v2908_v57 = vld [vmem:[#allocation8 + $0x238] sm:$0xf0] }
 0x119   :  { %v2923_v63 = vor.u32 %v3339_v55, %v2922_v27  ;;  %v2927_v27 = vor.u32 %v3337_v51, %v2924_v52  ;;  %v3051_v55 = vor.u32 %v3371_v54, %v3050_v60  ;;  %v2911_v0 = vor.u32 %v3333_v56, %v2908_v57 }
 0x11b   :  { %2055 = vmatpush.bf16.msrb.mxu1 %v2799_v61  ;;  %2016 = vmatpush.bf16.msra.mxu2 %v2923_v63  ;;  %v3034_v61 = vld [vmem:[#allocation8 + $0x328] sm:$0xf]  ;;  %v3367_v63 = vld [vmem:[#allocation8 + $0x334] sm:$0xf0] }
 0x11c   :  { %v3035_v1 = vor.u32 %v3367_v63, %v3034_v61 }
 0x11d   :  { %v1078_v5 = vpop.f32.mrf.mxu2  ;;  %v1054_v11 = vpop.f32.mrf.mxu0 }
 0x11e   :  { %v1079_v9 = vadd.f32 %v1078_v5, %v1066_v35  ;;  %v1091_v10 = vpop.f32.mrf.mxu3  ;;  %v1067_v14 = vpop.f32.mrf.mxu1  ;;  %v3329_v35 = vld [vmem:[#allocation8 + $0x20c] sm:$0xf]  ;;  %v3116_v11 = vld [vmem:[#allocation8 + $0x3d8] sm:$0xf0] }
 0x11f   :  { %2056 = vmatpush.bf16.msrb.mxu1 %v2783_v4  ;;  %2017 = vmatpush.bf16.msra.mxu2 %v2907_v6  ;;  %v3363_v4 = vld [vmem:[#allocation8 + $0x314] sm:$0xf0]  ;;  %v3389_v5 = vld [vmem:[#allocation8 + $0x3ec] sm:$0xf]  ;;  %v3132_v6 = vld [vmem:[#allocation8 + $0x3f8] sm:$0xf0]  ;;  %v2895_v7 = vor.u32 %v3329_v35, %v2892_v2 }
 0x120   :  { %v1092_v17 = vadd.f32 %v1091_v10, %v1079_v9  ;;  %v3019_v8 = vor.u32 %v3363_v4, %v3018_v3  ;;  %v3135_v9 = vor.u32 %v3389_v5, %v3132_v6  ;;  %v3385_v10 = vld [vmem:[#allocation8 + $0x3cc] sm:$0xf]  ;;  %v3100_v14 = vld [vmem:[#allocation8 + $0x3b8] sm:$0xf0] }
 0x121   :  { %v3119_v12 = vor.u32 %v3385_v10, %v3116_v11  ;;  %v3103_v15 = vor.u32 %v3381_v13, %v3100_v14 }
 0x122   :  { %v1098_v22 = vmax.f32 %v1092_v17, 0.0  ;;  %v3377_v17 = vld [vmem:[#allocation8 + $0x38c] sm:$0xf] }
 0x123   :  { %2057 = vmatpush.bf16.msrb.mxu1 %v2767_v18  ;;  %2018 = vmatpush.bf16.msra.mxu2 %v2891_v21  ;;  %v3084_v18 = vld [vmem:[#allocation8 + $0x398] sm:$0xf0] }
 0x124   :  { %v3650_v29 = vpack.c.bf16 %v1098_v22, %v1098_v22  ;;  %v3087_v19 = vor.u32 %v3377_v17, %v3084_v18  ;;  %v3068_v21 = vld [vmem:[#allocation8 + $0x378] sm:$0xf0] }
 0x125   :  { %v1080_v32 = vpop.f32.mrf.mxu2  ;;  %v3071_v22 = vor.u32 %v3373_v20, %v3068_v21 }
 0x126   :  { %v1093_v33 = vpop.f32.mrf.mxu3  ;;  %1928 = vmatmul.bf16.vlgmr.msra.gmra.mxu3 %v3650_v29  ;;  %2058 = vmatmul.bf16.vlgmr.msrb.gmra.mxu1 %v3637_v58  ;;  %v3341_v58 = vld [vmem:[#allocation8 + $0x26c] sm:$0xf] }
 0x127   :  { %2063 = vmatpush.bf16.msrb.mxu2 %v3007_v23  ;;  %2024 = vmatpush.bf16.msra.mxu3 %v3131_v24  ;;  %v2943_v50 = vor.u32 %v3341_v58, %v2940_v48  ;;  %v3369_v24 = vld [vmem:[#allocation8 + $0x34c] sm:$0xf]  ;;  %v1231_v48 = vld [vmem:[#allocation10] sm:$0xf] }
 0x128   :  { %2019 = vmatmul.bf16.vlgmr.msra.gmra.mxu2 %v3643_v26  ;;  %v3361_v33 = vld [vmem:[#allocation8 + $0x30c] sm:$0xf]  ;;  %v1233_v62 = vperm.slane %v1231_v48, 0  ;;  %v1234_v56 = vperm.slane %v1231_v48, 1  ;;  %v1235_v3 = vperm.slane %v1231_v48, 2  ;;  %v1236_v13 = vperm.slane %v1231_v48, 3 }
 0x12b   :  { %2064 = vmatpush.bf16.msrb.mxu2 %v2991_v34  ;;  %2025 = vmatpush.bf16.msra.mxu3 %v3115_v36  ;;  %v3020_v34 = vld [vmem:[#allocation8 + $0x318] sm:$0xf0] }
 0x12c   :  { %v3023_v36 = vor.u32 %v3361_v33, %v3020_v34 }
 0x12f   :  { %2065 = vmatpush.bf16.msrb.mxu2 %v2975_v41  ;;  %2026 = vmatpush.bf16.msra.mxu3 %v3099_v42 }
 0x133   :  { %2066 = vmatpush.bf16.msrb.mxu2 %v2959_v59  ;;  %2027 = vmatpush.bf16.msra.mxu3 %v3083_v47 }
 0x136   :  { %1980 = vmatmul.bf16.vlgmr.msrb.gmra.mxu3 %v3650_v29 }
 0x137   :  { %2067 = vmatpush.bf16.msrb.mxu2 %v2943_v50  ;;  %2028 = vmatpush.bf16.msra.mxu3 %v3067_v53 }
 0x13b   :  { %2068 = vmatpush.bf16.msrb.mxu2 %v2927_v27  ;;  %2029 = vmatpush.bf16.msra.mxu3 %v3051_v55 }
 0x13f   :  { %2069 = vmatpush.bf16.msrb.mxu2 %v2911_v0  ;;  %2030 = vmatpush.bf16.msra.mxu3 %v3035_v1 }
 0x143   :  { %2070 = vmatpush.bf16.msrb.mxu2 %v2895_v7  ;;  %2031 = vmatpush.bf16.msra.mxu3 %v3019_v8 }
 0x144   :  { %v1890_v16 = vpop.f32.mrf.mxu0 }
 0x145   :  { %v1891_v50 = vadd.f32 %v1890_v16, %v1233_v62 }
 0x146   :  { %2071 = vmatmul.bf16.vlgmr.msrb.gmra.mxu2 %v3643_v26  ;;  %2032 = vmatmul.bf16.vlgmr.msra.gmra.mxu3 %v3650_v29  ;;  %v3055_v26 = vor.u32 %v3369_v24, %v3052_v25 }
 0x147   :  { %2076 = vmatpush.bf16.msrb.mxu3 %v3135_v9 }
 0x14b   :  { %2077 = vmatpush.bf16.msrb.mxu3 %v3119_v12 }
 0x14c   :  { %v1892_v23 = vpop.f32.mrf.mxu0 }
 0x14f   :  { %2078 = vmatpush.bf16.msrb.mxu3 %v3103_v15 }
 0x153   :  { %2079 = vmatpush.bf16.msrb.mxu3 %v3087_v19 }
 0x155   :  { %v1942_v32 = vpop.f32.mrf.mxu0 }
 0x156   :  { %v1943_v63 = vadd.f32 %v1942_v32, %v1234_v56 }
 0x157   :  { %2080 = vmatpush.bf16.msrb.mxu3 %v3071_v22 }
 0x15b   :  { %2081 = vmatpush.bf16.msrb.mxu3 %v3055_v26 }
 0x15d   :  { %v1944_v37 = vpop.f32.mrf.mxu0 }
 0x15f   :  { %2082 = vmatpush.bf16.msrb.mxu3 %v3039_v31 }
 0x163   :  { %2083 = vmatpush.bf16.msrb.mxu3 %v3023_v36  ;;  %v1903_v38 = vpop.f32.mrf.mxu1 }
 0x164   :  { %v1904_v52 = vadd.f32 %v1903_v38, %v1891_v50 }
 0x166   :  { %2084 = vmatmul.bf16.vlgmr.msrb.gmra.mxu3 %v3650_v29 }
 0x16b   :  { %v1905_v40 = vpop.f32.mrf.mxu1 }
 0x173   :  { %v1955_v42 = vpop.f32.mrf.mxu1 }
 0x174   :  { %v1956_v0 = vadd.f32 %v1955_v42, %v1943_v63 }
 0x175   :  { %v1994_v39 = vpop.f32.mrf.mxu0 }
 0x176   :  { %v1995_v5 = vadd.f32 %v1994_v39, %v1235_v3 }
 0x17b   :  { %v1957_v43 = vpop.f32.mrf.mxu1 }
 0x17d   :  { %v1996_v41 = vpop.f32.mrf.mxu0 }
 0x183   :  { %v2007_v44 = vpop.f32.mrf.mxu1 }
 0x184   :  { %v2008_v6 = vadd.f32 %v2007_v44, %v1995_v5 }
 0x189   :  { %v1916_v46 = vpop.f32.mrf.mxu2 }
 0x18a   :  { %v1917_v29 = vadd.f32 %v1916_v46, %v1904_v52 }
 0x18b   :  { %v2009_v59 = vpop.f32.mrf.mxu1 }
 0x191   :  { %v1918_v58 = vpop.f32.mrf.mxu2 }
 0x195   :  { %v2046_v45 = vpop.f32.mrf.mxu0 }
 0x196   :  { %v2047_v14 = vadd.f32 %v2046_v45, %v1236_v13 }
 0x199   :  { %v1968_v49 = vpop.f32.mrf.mxu2 }
 0x19a   :  { %v1969_v1 = vadd.f32 %v1968_v49, %v1956_v0 }
 0x19d   :  { %v2048_v47 = vpop.f32.mrf.mxu0 }
 0x1a1   :  { %v1970_v53 = vpop.f32.mrf.mxu2 }
 0x1a3   :  { %v2059_v51 = vpop.f32.mrf.mxu1 }
 0x1a4   :  { %v2060_v15 = vadd.f32 %v2059_v51, %v2047_v14 }
 0x1a9   :  { %v1929_v60 = vpop.f32.mrf.mxu3 }
 0x1aa   :  { %v1930_v54 = vadd.f32 %v1929_v60, %v1917_v29 }
 0x1ab   :  { %v2020_v27 = vpop.f32.mrf.mxu2  ;;  %v2061_v55 = vpop.f32.mrf.mxu1 }
 0x1ac   :  { %2089 = vst [vmem:[#allocation11] sm:$0xff] %v1930_v54  ;;  %v2021_v7 = vadd.f32 %v2020_v27, %v2008_v6 }
 0x1b1   :  { %v1931_v57 = vpop.f32.mrf.mxu3 }
 0x1b3   :  { %v2022_v61 = vpop.f32.mrf.mxu2 }
 0x1b9   :  { %v1981_v35 = vpop.f32.mrf.mxu3 }
 0x1ba   :  { %v1982_v2 = vadd.f32 %v1981_v35, %v1969_v1 }
 0x1bc   :  { %2090 = vst [vmem:[#allocation11 + $0x8] sm:$0xff] %v1982_v2 }
 0x1c1   :  { %v1983_v4 = vpop.f32.mrf.mxu3 }
 0x1c9   :  { %v2072_v8 = vpop.f32.mrf.mxu2  ;;  %v2033_v9 = vpop.f32.mrf.mxu3 }
 0x1ca   :  { %v2034_v10 = vadd.f32 %v2033_v9, %v2021_v7  ;;  %v2073_v16 = vadd.f32 %v2072_v8, %v2060_v15 }
 0x1cc   :  { %2091 = vst [vmem:[#allocation11 + $0x10] sm:$0xff] %v2034_v10 }
 0x1d1   :  { %v2074_v11 = vpop.f32.mrf.mxu2  ;;  %v2035_v12 = vpop.f32.mrf.mxu3 }
 0x1e9   :  { %v2085_v17 = vpop.f32.mrf.mxu3 }
 0x1ea   :  { %v2086_v18 = vadd.f32 %v2085_v17, %v2073_v16 }
 0x1ec   :  { %2092 = vst [vmem:[#allocation11 + $0x18] sm:$0xff] %v2086_v18 }
 0x1ed   :  { %2103 = dma.vmem_to_hbm [thread:$0]  %s2099_s4, 512, %s2101_s19, [#allocation4]  }
 0x1f1   :  { %v2087_v19 = vpop.f32.mrf.mxu3 }
 0x1f2   :  { %3550 = dma.done.wait [#allocation4], 512  }
 0x1f3   :  { %3551 = vsyncadd [#allocation4], 4294966784 }
 0x1f4   :  { %2108 = vsyncpa [#allocation3], 1 }
 0x1f5   :  { %2109 = vsyncpa [#allocation6], 1 }
 0x1f6   :  { %2110 = vsyncpa [#allocation9], 1 }
 0x1f7   :  { %2111 = vsyncpa [#allocation4], 1 }

</bundles_post_ra>
